<compile_context>
chip_gen: v7x
topology: tpu7x:2x2x1
jax: 0.10.0
libtpu: 0.0.40
codegen_flags: <defaults>
</compile_context>

<pallas_src>
import functools
import math

import jax
import jax.numpy as jnp
from jax.experimental import pallas as pl
from jax.experimental.pallas import tpu as pltpu


# ------------------------- one-time parameter prep ---------------------------

def prepare_params(params, *, heads):
    """Pack weights once (NOT per forward call).

    direction 0: queries from tensor2 (W_Q2), keys/values from tensor1 (W_K1/W_V1), fc1
    direction 1: queries from tensor1 (W_Q1), keys/values from tensor2 (W_K2/W_V2), fc2
    """
    E = params['wq1'].shape[0]
    assert E % heads == 0, "embed_size must be divisible by heads"
    D = E // heads
    scale = 1.0 / math.sqrt(E)          # PyTorch divides energy by embed_size ** 0.5

    wq = jnp.stack([params['wq2'], params['wq1']]).astype(jnp.float32) * scale   # (2, E, E)
    wkv = jnp.stack([
        jnp.concatenate([params['wk1'], params['wv1']], axis=1),
        jnp.concatenate([params['wk2'], params['wv2']], axis=1),
    ])                                                                            # (2, E, 2E)
    fc = jnp.stack([params['fc1'], params['fc2']]).reshape(2, heads, D, E)        # (2, H, D, E)

    return dict(wq=wq.astype(jnp.bfloat16),
                wkv=wkv.astype(jnp.bfloat16),
                fc=fc.astype(jnp.bfloat16))


# ------------------------------ fused kernel --------------------------------

def _bicross_kernel(t1_ref, t2_ref, wq_ref, wkv_ref, fc_ref,   # inputs
                    o1_ref, o2_ref,                            # outputs
                    *, heads, head_dim):
    """One grid step == one batch tile; BOTH cross-attention directions computed here."""
    Bn, L, E = t1_ref.shape
    H, D = heads, head_dim
    rows = Bn * L

    # Both activation blocks are needed by both directions -> load once, cast to bf16.
    x1 = t1_ref[...].reshape(rows, E).astype(jnp.bfloat16)
    x2 = t2_ref[...].reshape(rows, E).astype(jnp.bfloat16)

    def direction(xq, xkv, d):
        # Lane-dense MXU projections; softmax scale already folded into W_Q,
        # K and V packed into a single (E, 2E) matmul.
        qp = jnp.dot(xq, wq_ref[d], preferred_element_type=jnp.float32)     # (rows, E)  f32
        kvp = jnp.dot(xkv, wkv_ref[d], preferred_element_type=jnp.float32)  # (rows, 2E) f32
        kp = kvp[:, :E]
        vp = kvp[:, E:]

        out = jnp.zeros((rows, E), jnp.float32)
        for h in range(H):                       # statically unrolled
            lo = h * D
            qh = qp[:, lo:lo + D].reshape(Bn, L, D).astype(jnp.bfloat16)
            kh = kp[:, lo:lo + D].reshape(Bn, L, D).astype(jnp.bfloat16)
            vh = vp[:, lo:lo + D].reshape(Bn, L, D).astype(jnp.bfloat16)

            s = jnp.einsum('nqd,nkd->nqk', qh, kh,
                           preferred_element_type=jnp.float32)              # (Bn, L, L) f32
            s = s - jnp.max(s, axis=-1, keepdims=True)
            p = jnp.exp(s)
            p = p * pl.reciprocal(jnp.sum(p, axis=-1, keepdims=True), approx=False)

            ctx = jnp.einsum('nqk,nkd->nqd', p.astype(jnp.bfloat16), vh,
                             preferred_element_type=jnp.float32)            # (Bn, L, D) f32

            # Output projection accumulated per head: fc is pre-reshaped head-major
            # (2, H, D, E), so this is a full lane-dense matmul with no ctx scratch
            # and no masked partial stores.
            out = out + jnp.dot(ctx.reshape(rows, D).astype(jnp.bfloat16), fc_ref[d, h],
                                preferred_element_type=jnp.float32)
        return out                                                          # (rows, E) f32

    # direction 0: Q from tensor2, K/V from tensor1, fc1  -> out1
    # direction 1: Q from tensor1, K/V from tensor2, fc2  -> out2
    o1_ref[...] = direction(x2, x1, 0).reshape(Bn, L, E).astype(o1_ref.dtype)
    o2_ref[...] = direction(x1, x2, 1).reshape(Bn, L, E).astype(o2_ref.dtype)


def _vmem_limit_bytes(block_n, L, E, heads):
    rows = block_n * L
    act_block = rows * E * 4                                # one f32 activation block
    weights = (E * E + E * 2 * E + E * E) * 2 * 2           # both directions, bf16
    inter = rows * (4 * E + 2 * L) * 4                      # qp/kvp/out f32 + scores, rough
    need = weights + 2 * (2 + 2) * act_block + 2 * inter    # double-buffered 2 in + 2 out
    return int(min(max(2 * need, 4 << 20), 48 << 20))       # stay under v7x's 64 MiB/TC


def bicross_attention(input_tensor1, input_tensor2, packed, *, heads, block_n=1):
    """Fused BicrossAttention forward. Returns (out1, out2).

    `packed` comes from prepare_params() (one-time weight packing, bf16, scale folded).
    """
    N, L, E = input_tensor1.shape
    assert input_tensor2.shape == (N, L, E), "fused path assumes equal shapes (as in fusion_transformer)"
    assert E % heads == 0, "embed_size must be divisible by heads"
    assert N % block_n == 0, "batch must be divisible by block_n"
    D = E // heads

    # Advisory cost hint for XLA scheduling around the single fused custom call.
    flops = 2 * (8 * N * L * E * E + 4 * N * L * L * E)
    transcendentals = 2 * N * heads * L * L
    bytes_accessed = 4 * N * L * E * 4 + 8 * E * E * 2

    out1, out2 = pl.pallas_call(
        functools.partial(_bicross_kernel, heads=heads, head_dim=D),
        out_shape=(jax.ShapeDtypeStruct((N, L, E), input_tensor1.dtype),
                   jax.ShapeDtypeStruct((N, L, E), input_tensor1.dtype)),
        grid=(N // block_n,),
        in_specs=[
            # Activations: pipelined per batch tile (no duplication across directions).
            pl.BlockSpec((block_n, L, E), lambda b: (b, 0, 0)),
            pl.BlockSpec((block_n, L, E), lambda b: (b, 0, 0)),
            # Weights: constant index maps -> fetched once, VMEM-resident across the grid.
            pl.BlockSpec((2, E, E), lambda b: (0, 0, 0)),
            pl.BlockSpec((2, E, 2 * E), lambda b: (0, 0, 0)),
            pl.BlockSpec((2, heads, D, E), lambda b: (0, 0, 0, 0)),
        ],
        out_specs=(
            pl.BlockSpec((block_n, L, E), lambda b: (b, 0, 0)),
            pl.BlockSpec((block_n, L, E), lambda b: (b, 0, 0)),
        ),
        compiler_params=pltpu.CompilerParams(
            dimension_semantics=("parallel",),           # batch tiles are independent
            vmem_limit_bytes=_vmem_limit_bytes(block_n, L, E, heads),
        ),
        cost_estimate=pl.CostEstimate(flops=flops,
                                      transcendentals=transcendentals,
                                      bytes_accessed=bytes_accessed),
    )(input_tensor1, input_tensor2, packed['wq'], packed['wkv'], packed['fc'])

    return out1, out2


# ------------------------------ pure-JAX reference ---------------------------

def bicross_reference(t1, t2, p, heads):
    N, L, E = t1.shape
    D = E // heads
    v1 = (t1 @ p['wv1']).reshape(N, L, heads, D)
    q1 = (t1 @ p['wq1']).reshape(N, L, heads, D)
    k1 = (t1 @ p['wk1']).reshape(N, L, heads, D)
    v2 = (t2 @ p['wv2']).reshape(N, L, heads, D)
    q2 = (t2 @ p['wq2']).reshape(N, L, heads, D)
    k2 = (t2 @ p['wk2']).reshape(N, L, heads, D)
    e1 = jnp.einsum('nqhd,nkhd->nhqk', q2, k1) / math.sqrt(E)
    e2 = jnp.einsum('nqhd,nkhd->nhqk', q1, k2) / math.sqrt(E)
    a1 = jax.nn.softmax(e1, axis=3)
    a2 = jax.nn.softmax(e2, axis=3)
    c1 = jnp.einsum('nhql,nlhd->nqhd', a1, v1).reshape(N, L, E)
    c2 = jnp.einsum('nhql,nlhd->nqhd', a2, v2).reshape(N, L, E)
    return c1 @ p['fc1'], c2 @ p['fc2']


# --------------------------------- main --------------------------------------

if __name__ == "__main__":
    N, L, E, HEADS = 2, 8, 32, 4          # head_dim = 8

    key = jax.random.PRNGKey(0)
    keys = jax.random.split(key, 10)

    def w(k):
        # Weights stored in (in, out) layout so application is x @ w
        # (equivalent to PyTorch's x @ W.T with W of shape (out, in)).
        return jax.random.normal(k, (E, E), jnp.float32) / math.sqrt(E)

    params = dict(
        wq1=w(keys[0]), wk1=w(keys[1]), wv1=w(keys[2]), fc1=w(keys[3]),
        wq2=w(keys[4]), wk2=w(keys[5]), wv2=w(keys[6]), fc2=w(keys[7]),
    )
    t1 = jax.random.normal(keys[8], (N, L, E), jnp.float32)
    t2 = jax.random.normal(keys[9], (N, L, E), jnp.float32)

    # One-time weight packing (outside the forward / jit of the forward).
    packed = prepare_params(params, heads=HEADS)

    fwd = jax.jit(functools.partial(bicross_attention, heads=HEADS, block_n=1))
    out1, out2 = fwd(t1, t2, packed)
    out1 = jax.block_until_ready(out1)
    out2 = jax.block_until_ready(out2)

    assert out1.shape == (N, L, E), out1.shape
    assert out2.shape == (N, L, E), out2.shape
    assert bool(jnp.all(jnp.isfinite(out1))) and bool(jnp.all(jnp.isfinite(out2)))

    # Reference uses bf16-rounded weights (same quantization as the kernel's packed
    # weights) so the tolerance only has to cover bf16 activation/matmul drift.
    params_bf = {k: v.astype(jnp.bfloat16).astype(jnp.float32) for k, v in params.items()}
    ref1, ref2 = bicross_reference(t1, t2, params_bf, HEADS)
    assert bool(jnp.allclose(out1, ref1, atol=2e-2, rtol=2e-2))
    assert bool(jnp.allclose(out2, ref2, atol=2e-2, rtol=2e-2))

    print("KERNEL_OK")
</pallas_src>

<mosaic_0001>
module attributes {stable_mosaic.version = 11 : i64} {
  func.func @_bicross_kernel(%arg0: i32, %arg1: memref<1x8x32xf32, #tpu.memory_space<vmem>>, %arg2: memref<1x8x32xf32, #tpu.memory_space<vmem>>, %arg3: memref<2x32x32xbf16, #tpu.memory_space<vmem>>, %arg4: memref<2x32x64xbf16, #tpu.memory_space<vmem>>, %arg5: memref<2x4x8x32xbf16, #tpu.memory_space<vmem>>, %arg6: memref<1x8x32xf32, #tpu.memory_space<vmem>>, %arg7: memref<1x8x32xf32, #tpu.memory_space<vmem>>) attributes {dimension_semantics = [#tpu.dimension_semantics<parallel>], iteration_bounds = array<i64: 2>, scalar_prefetch = 0 : i64, scratch_operands = 0 : i64, tpu.core_type = #tpu.core_type<tc>, window_params = [{transform_indices = @transform_0, window_bounds = array<i64: 1, 8, 32>}, {transform_indices = @transform_1, window_bounds = array<i64: 1, 8, 32>}, {pipeline_mode = #tpu.pipeline_mode<synchronous>, transform_indices = @transform_2, window_bounds = array<i64: 2, 32, 32>}, {pipeline_mode = #tpu.pipeline_mode<synchronous>, transform_indices = @transform_3, window_bounds = array<i64: 2, 32, 64>}, {pipeline_mode = #tpu.pipeline_mode<synchronous>, transform_indices = @transform_4, window_bounds = array<i64: 2, 4, 8, 32>}, {transform_indices = @transform_5, window_bounds = array<i64: 1, 8, 32>}, {transform_indices = @transform_6, window_bounds = array<i64: 1, 8, 32>}]} {
    %c0 = arith.constant 0 : index
    %c0_0 = arith.constant 0 : index
    %c0_1 = arith.constant 0 : index
    %0 = vector.load %arg1[%c0, %c0_0, %c0_1] : memref<1x8x32xf32, #tpu.memory_space<vmem>>, vector<1x8x32xf32>
    %1 = vector.shape_cast %0 : vector<1x8x32xf32> to vector<8x32xf32>
    %2 = arith.truncf %1 : vector<8x32xf32> to vector<8x32xbf16>
    %c0_2 = arith.constant 0 : index
    %c0_3 = arith.constant 0 : index
    %c0_4 = arith.constant 0 : index
    %3 = vector.load %arg2[%c0_2, %c0_3, %c0_4] : memref<1x8x32xf32, #tpu.memory_space<vmem>>, vector<1x8x32xf32>
    %4 = vector.shape_cast %3 : vector<1x8x32xf32> to vector<8x32xf32>
    %5 = arith.truncf %4 : vector<8x32xf32> to vector<8x32xbf16>
    %c0_5 = arith.constant 0 : index
    %c0_6 = arith.constant 0 : index
    %c0_7 = arith.constant 0 : index
    %6 = vector.load %arg3[%c0_5, %c0_6, %c0_7] : memref<2x32x32xbf16, #tpu.memory_space<vmem>>, vector<1x32x32xbf16>
    %7 = vector.shape_cast %6 : vector<1x32x32xbf16> to vector<32x32xbf16>
    %cst = arith.constant dense<0.000000e+00> : vector<8x32xf32>
    %8 = tpu.matmul %5, %7, %cst {dimension_numbers = #tpu.dot_dimension_numbers<[1], [0], [0], [1], [0, 0, 1, 1], [], []>} : vector<8x32xbf16>, vector<32x32xbf16>, vector<8x32xf32> -> vector<8x32xf32>
    %c0_8 = arith.constant 0 : index
    %c0_9 = arith.constant 0 : index
    %c0_10 = arith.constant 0 : index
    %9 = vector.load %arg4[%c0_8, %c0_9, %c0_10] : memref<2x32x64xbf16, #tpu.memory_space<vmem>>, vector<1x32x64xbf16>
    %10 = vector.shape_cast %9 : vector<1x32x64xbf16> to vector<32x64xbf16>
    %cst_11 = arith.constant dense<0.000000e+00> : vector<8x64xf32>
    %11 = tpu.matmul %2, %10, %cst_11 {dimension_numbers = #tpu.dot_dimension_numbers<[1], [0], [0], [1], [0, 0, 1, 1], [], []>} : vector<8x32xbf16>, vector<32x64xbf16>, vector<8x64xf32> -> vector<8x64xf32>
    %12 = vector.extract_strided_slice %11 {offsets = [0, 0], sizes = [8, 32], strides = [1, 1]} : vector<8x64xf32> to vector<8x32xf32>
    %13 = vector.extract_strided_slice %11 {offsets = [0, 32], sizes = [8, 32], strides = [1, 1]} : vector<8x64xf32> to vector<8x32xf32>
    %cst_12 = arith.constant 0.000000e+00 : f32
    %14 = vector.broadcast %cst_12 : f32 to vector<8x32xf32>
    %15 = vector.extract_strided_slice %8 {offsets = [0, 0], sizes = [8, 8], strides = [1, 1]} : vector<8x32xf32> to vector<8x8xf32>
    %16 = vector.shape_cast %15 : vector<8x8xf32> to vector<1x8x8xf32>
    %17 = arith.truncf %16 : vector<1x8x8xf32> to vector<1x8x8xbf16>
    %18 = vector.extract_strided_slice %12 {offsets = [0, 0], sizes = [8, 8], strides = [1, 1]} : vector<8x32xf32> to vector<8x8xf32>
    %19 = vector.shape_cast %18 : vector<8x8xf32> to vector<1x8x8xf32>
    %20 = arith.truncf %19 : vector<1x8x8xf32> to vector<1x8x8xbf16>
    %21 = vector.extract_strided_slice %13 {offsets = [0, 0], sizes = [8, 8], strides = [1, 1]} : vector<8x32xf32> to vector<8x8xf32>
    %22 = vector.shape_cast %21 : vector<8x8xf32> to vector<1x8x8xf32>
    %23 = arith.truncf %22 : vector<1x8x8xf32> to vector<1x8x8xbf16>
    "tpu.trace_start"() <{level = 10 : i32, message = "nqd,nkd->nqk"}> : () -> ()
    %cst_13 = arith.constant dense<0.000000e+00> : vector<1x8x8xf32>
    %24 = tpu.matmul %17, %20, %cst_13 {dimension_numbers = #tpu.dot_dimension_numbers<[2], [2], [1], [1], [0, 0, 0, 1, 1, 1], [0], [0]>} : vector<1x8x8xbf16>, vector<1x8x8xbf16>, vector<1x8x8xf32> -> vector<1x8x8xf32>
    "tpu.trace_stop"() : () -> ()
    %cst_14 = arith.constant dense<0xFF800000> : vector<1x8xf32>
    %25 = vector.multi_reduction <maximumf>, %24, %cst_14 [2] : vector<1x8x8xf32> to vector<1x8xf32>
    %26 = vector.shape_cast %25 : vector<1x8xf32> to vector<1x8x1xf32>
    %27 = vector.broadcast %26 : vector<1x8x1xf32> to vector<1x8x8xf32>
    %28 = arith.subf %24, %27 : vector<1x8x8xf32>
    %29 = math.exp %28 : vector<1x8x8xf32>
    %cst_15 = arith.constant dense<0.000000e+00> : vector<1x8xf32>
    %30 = vector.multi_reduction <add>, %29, %cst_15 [2] : vector<1x8x8xf32> to vector<1x8xf32>
    %31 = vector.shape_cast %30 : vector<1x8xf32> to vector<1x8x1xf32>
    %32 = tpu.reciprocal %31 : vector<1x8x1xf32> -> vector<1x8x1xf32>
    %33 = vector.broadcast %32 : vector<1x8x1xf32> to vector<1x8x8xf32>
    %34 = arith.mulf %29, %33 : vector<1x8x8xf32>
    %35 = arith.truncf %34 : vector<1x8x8xf32> to vector<1x8x8xbf16>
    "tpu.trace_start"() <{level = 10 : i32, message = "nqk,nkd->nqd"}> : () -> ()
    %cst_16 = arith.constant dense<0.000000e+00> : vector<1x8x8xf32>
    %36 = tpu.matmul %35, %23, %cst_16 {dimension_numbers = #tpu.dot_dimension_numbers<[2], [1], [1], [2], [0, 0, 0, 1, 1, 2], [0], [0]>} : vector<1x8x8xbf16>, vector<1x8x8xbf16>, vector<1x8x8xf32> -> vector<1x8x8xf32>
    "tpu.trace_stop"() : () -> ()
    %37 = vector.shape_cast %36 : vector<1x8x8xf32> to vector<8x8xf32>
    %38 = arith.truncf %37 : vector<8x8xf32> to vector<8x8xbf16>
    %c0_17 = arith.constant 0 : index
    %c0_18 = arith.constant 0 : index
    %c0_19 = arith.constant 0 : index
    %c0_20 = arith.constant 0 : index
    %39 = vector.load %arg5[%c0_17, %c0_18, %c0_19, %c0_20] : memref<2x4x8x32xbf16, #tpu.memory_space<vmem>>, vector<1x1x8x32xbf16>
    %40 = vector.shape_cast %39 : vector<1x1x8x32xbf16> to vector<8x32xbf16>
    %cst_21 = arith.constant dense<0.000000e+00> : vector<8x32xf32>
    %41 = tpu.matmul %38, %40, %cst_21 {dimension_numbers = #tpu.dot_dimension_numbers<[1], [0], [0], [1], [0, 0, 1, 1], [], []>} : vector<8x8xbf16>, vector<8x32xbf16>, vector<8x32xf32> -> vector<8x32xf32>
    %42 = arith.addf %14, %41 : vector<8x32xf32>
    %43 = vector.extract_strided_slice %8 {offsets = [0, 8], sizes = [8, 8], strides = [1, 1]} : vector<8x32xf32> to vector<8x8xf32>
    %44 = vector.shape_cast %43 : vector<8x8xf32> to vector<1x8x8xf32>
    %45 = arith.truncf %44 : vector<1x8x8xf32> to vector<1x8x8xbf16>
    %46 = vector.extract_strided_slice %12 {offsets = [0, 8], sizes = [8, 8], strides = [1, 1]} : vector<8x32xf32> to vector<8x8xf32>
    %47 = vector.shape_cast %46 : vector<8x8xf32> to vector<1x8x8xf32>
    %48 = arith.truncf %47 : vector<1x8x8xf32> to vector<1x8x8xbf16>
    %49 = vector.extract_strided_slice %13 {offsets = [0, 8], sizes = [8, 8], strides = [1, 1]} : vector<8x32xf32> to vector<8x8xf32>
    %50 = vector.shape_cast %49 : vector<8x8xf32> to vector<1x8x8xf32>
    %51 = arith.truncf %50 : vector<1x8x8xf32> to vector<1x8x8xbf16>
    "tpu.trace_start"() <{level = 10 : i32, message = "nqd,nkd->nqk"}> : () -> ()
    %cst_22 = arith.constant dense<0.000000e+00> : vector<1x8x8xf32>
    %52 = tpu.matmul %45, %48, %cst_22 {dimension_numbers = #tpu.dot_dimension_numbers<[2], [2], [1], [1], [0, 0, 0, 1, 1, 1], [0], [0]>} : vector<1x8x8xbf16>, vector<1x8x8xbf16>, vector<1x8x8xf32> -> vector<1x8x8xf32>
    "tpu.trace_stop"() : () -> ()
    %cst_23 = arith.constant dense<0xFF800000> : vector<1x8xf32>
    %53 = vector.multi_reduction <maximumf>, %52, %cst_23 [2] : vector<1x8x8xf32> to vector<1x8xf32>
    %54 = vector.shape_cast %53 : vector<1x8xf32> to vector<1x8x1xf32>
    %55 = vector.broadcast %54 : vector<1x8x1xf32> to vector<1x8x8xf32>
    %56 = arith.subf %52, %55 : vector<1x8x8xf32>
    %57 = math.exp %56 : vector<1x8x8xf32>
    %cst_24 = arith.constant dense<0.000000e+00> : vector<1x8xf32>
    %58 = vector.multi_reduction <add>, %57, %cst_24 [2] : vector<1x8x8xf32> to vector<1x8xf32>
    %59 = vector.shape_cast %58 : vector<1x8xf32> to vector<1x8x1xf32>
    %60 = tpu.reciprocal %59 : vector<1x8x1xf32> -> vector<1x8x1xf32>
    %61 = vector.broadcast %60 : vector<1x8x1xf32> to vector<1x8x8xf32>
    %62 = arith.mulf %57, %61 : vector<1x8x8xf32>
    %63 = arith.truncf %62 : vector<1x8x8xf32> to vector<1x8x8xbf16>
    "tpu.trace_start"() <{level = 10 : i32, message = "nqk,nkd->nqd"}> : () -> ()
    %cst_25 = arith.constant dense<0.000000e+00> : vector<1x8x8xf32>
    %64 = tpu.matmul %63, %51, %cst_25 {dimension_numbers = #tpu.dot_dimension_numbers<[2], [1], [1], [2], [0, 0, 0, 1, 1, 2], [0], [0]>} : vector<1x8x8xbf16>, vector<1x8x8xbf16>, vector<1x8x8xf32> -> vector<1x8x8xf32>
    "tpu.trace_stop"() : () -> ()
    %65 = vector.shape_cast %64 : vector<1x8x8xf32> to vector<8x8xf32>
    %66 = arith.truncf %65 : vector<8x8xf32> to vector<8x8xbf16>
    %c0_26 = arith.constant 0 : index
    %c1 = arith.constant 1 : index
    %c0_27 = arith.constant 0 : index
    %c0_28 = arith.constant 0 : index
    %67 = vector.load %arg5[%c0_26, %c1, %c0_27, %c0_28] : memref<2x4x8x32xbf16, #tpu.memory_space<vmem>>, vector<1x1x8x32xbf16>
    %68 = vector.shape_cast %67 : vector<1x1x8x32xbf16> to vector<8x32xbf16>
    %cst_29 = arith.constant dense<0.000000e+00> : vector<8x32xf32>
    %69 = tpu.matmul %66, %68, %cst_29 {dimension_numbers = #tpu.dot_dimension_numbers<[1], [0], [0], [1], [0, 0, 1, 1], [], []>} : vector<8x8xbf16>, vector<8x32xbf16>, vector<8x32xf32> -> vector<8x32xf32>
    %70 = arith.addf %42, %69 : vector<8x32xf32>
    %71 = vector.extract_strided_slice %8 {offsets = [0, 16], sizes = [8, 8], strides = [1, 1]} : vector<8x32xf32> to vector<8x8xf32>
    %72 = vector.shape_cast %71 : vector<8x8xf32> to vector<1x8x8xf32>
    %73 = arith.truncf %72 : vector<1x8x8xf32> to vector<1x8x8xbf16>
    %74 = vector.extract_strided_slice %12 {offsets = [0, 16], sizes = [8, 8], strides = [1, 1]} : vector<8x32xf32> to vector<8x8xf32>
    %75 = vector.shape_cast %74 : vector<8x8xf32> to vector<1x8x8xf32>
    %76 = arith.truncf %75 : vector<1x8x8xf32> to vector<1x8x8xbf16>
    %77 = vector.extract_strided_slice %13 {offsets = [0, 16], sizes = [8, 8], strides = [1, 1]} : vector<8x32xf32> to vector<8x8xf32>
    %78 = vector.shape_cast %77 : vector<8x8xf32> to vector<1x8x8xf32>
    %79 = arith.truncf %78 : vector<1x8x8xf32> to vector<1x8x8xbf16>
    "tpu.trace_start"() <{level = 10 : i32, message = "nqd,nkd->nqk"}> : () -> ()
    %cst_30 = arith.constant dense<0.000000e+00> : vector<1x8x8xf32>
    %80 = tpu.matmul %73, %76, %cst_30 {dimension_numbers = #tpu.dot_dimension_numbers<[2], [2], [1], [1], [0, 0, 0, 1, 1, 1], [0], [0]>} : vector<1x8x8xbf16>, vector<1x8x8xbf16>, vector<1x8x8xf32> -> vector<1x8x8xf32>
    "tpu.trace_stop"() : () -> ()
    %cst_31 = arith.constant dense<0xFF800000> : vector<1x8xf32>
    %81 = vector.multi_reduction <maximumf>, %80, %cst_31 [2] : vector<1x8x8xf32> to vector<1x8xf32>
    %82 = vector.shape_cast %81 : vector<1x8xf32> to vector<1x8x1xf32>
    %83 = vector.broadcast %82 : vector<1x8x1xf32> to vector<1x8x8xf32>
    %84 = arith.subf %80, %83 : vector<1x8x8xf32>
    %85 = math.exp %84 : vector<1x8x8xf32>
    %cst_32 = arith.constant dense<0.000000e+00> : vector<1x8xf32>
    %86 = vector.multi_reduction <add>, %85, %cst_32 [2] : vector<1x8x8xf32> to vector<1x8xf32>
    %87 = vector.shape_cast %86 : vector<1x8xf32> to vector<1x8x1xf32>
    %88 = tpu.reciprocal %87 : vector<1x8x1xf32> -> vector<1x8x1xf32>
    %89 = vector.broadcast %88 : vector<1x8x1xf32> to vector<1x8x8xf32>
    %90 = arith.mulf %85, %89 : vector<1x8x8xf32>
    %91 = arith.truncf %90 : vector<1x8x8xf32> to vector<1x8x8xbf16>
    "tpu.trace_start"() <{level = 10 : i32, message = "nqk,nkd->nqd"}> : () -> ()
    %cst_33 = arith.constant dense<0.000000e+00> : vector<1x8x8xf32>
    %92 = tpu.matmul %91, %79, %cst_33 {dimension_numbers = #tpu.dot_dimension_numbers<[2], [1], [1], [2], [0, 0, 0, 1, 1, 2], [0], [0]>} : vector<1x8x8xbf16>, vector<1x8x8xbf16>, vector<1x8x8xf32> -> vector<1x8x8xf32>
    "tpu.trace_stop"() : () -> ()
    %93 = vector.shape_cast %92 : vector<1x8x8xf32> to vector<8x8xf32>
    %94 = arith.truncf %93 : vector<8x8xf32> to vector<8x8xbf16>
    %c0_34 = arith.constant 0 : index
    %c2 = arith.constant 2 : index
    %c0_35 = arith.constant 0 : index
    %c0_36 = arith.constant 0 : index
    %95 = vector.load %arg5[%c0_34, %c2, %c0_35, %c0_36] : memref<2x4x8x32xbf16, #tpu.memory_space<vmem>>, vector<1x1x8x32xbf16>
    %96 = vector.shape_cast %95 : vector<1x1x8x32xbf16> to vector<8x32xbf16>
    %cst_37 = arith.constant dense<0.000000e+00> : vector<8x32xf32>
    %97 = tpu.matmul %94, %96, %cst_37 {dimension_numbers = #tpu.dot_dimension_numbers<[1], [0], [0], [1], [0, 0, 1, 1], [], []>} : vector<8x8xbf16>, vector<8x32xbf16>, vector<8x32xf32> -> vector<8x32xf32>
    %98 = arith.addf %70, %97 : vector<8x32xf32>
    %99 = vector.extract_strided_slice %8 {offsets = [0, 24], sizes = [8, 8], strides = [1, 1]} : vector<8x32xf32> to vector<8x8xf32>
    %100 = vector.shape_cast %99 : vector<8x8xf32> to vector<1x8x8xf32>
    %101 = arith.truncf %100 : vector<1x8x8xf32> to vector<1x8x8xbf16>
    %102 = vector.extract_strided_slice %12 {offsets = [0, 24], sizes = [8, 8], strides = [1, 1]} : vector<8x32xf32> to vector<8x8xf32>
    %103 = vector.shape_cast %102 : vector<8x8xf32> to vector<1x8x8xf32>
    %104 = arith.truncf %103 : vector<1x8x8xf32> to vector<1x8x8xbf16>
    %105 = vector.extract_strided_slice %13 {offsets = [0, 24], sizes = [8, 8], strides = [1, 1]} : vector<8x32xf32> to vector<8x8xf32>
    %106 = vector.shape_cast %105 : vector<8x8xf32> to vector<1x8x8xf32>
    %107 = arith.truncf %106 : vector<1x8x8xf32> to vector<1x8x8xbf16>
    "tpu.trace_start"() <{level = 10 : i32, message = "nqd,nkd->nqk"}> : () -> ()
    %cst_38 = arith.constant dense<0.000000e+00> : vector<1x8x8xf32>
    %108 = tpu.matmul %101, %104, %cst_38 {dimension_numbers = #tpu.dot_dimension_numbers<[2], [2], [1], [1], [0, 0, 0, 1, 1, 1], [0], [0]>} : vector<1x8x8xbf16>, vector<1x8x8xbf16>, vector<1x8x8xf32> -> vector<1x8x8xf32>
    "tpu.trace_stop"() : () -> ()
    %cst_39 = arith.constant dense<0xFF800000> : vector<1x8xf32>
    %109 = vector.multi_reduction <maximumf>, %108, %cst_39 [2] : vector<1x8x8xf32> to vector<1x8xf32>
    %110 = vector.shape_cast %109 : vector<1x8xf32> to vector<1x8x1xf32>
    %111 = vector.broadcast %110 : vector<1x8x1xf32> to vector<1x8x8xf32>
    %112 = arith.subf %108, %111 : vector<1x8x8xf32>
    %113 = math.exp %112 : vector<1x8x8xf32>
    %cst_40 = arith.constant dense<0.000000e+00> : vector<1x8xf32>
    %114 = vector.multi_reduction <add>, %113, %cst_40 [2] : vector<1x8x8xf32> to vector<1x8xf32>
    %115 = vector.shape_cast %114 : vector<1x8xf32> to vector<1x8x1xf32>
    %116 = tpu.reciprocal %115 : vector<1x8x1xf32> -> vector<1x8x1xf32>
    %117 = vector.broadcast %116 : vector<1x8x1xf32> to vector<1x8x8xf32>
    %118 = arith.mulf %113, %117 : vector<1x8x8xf32>
    %119 = arith.truncf %118 : vector<1x8x8xf32> to vector<1x8x8xbf16>
    "tpu.trace_start"() <{level = 10 : i32, message = "nqk,nkd->nqd"}> : () -> ()
    %cst_41 = arith.constant dense<0.000000e+00> : vector<1x8x8xf32>
    %120 = tpu.matmul %119, %107, %cst_41 {dimension_numbers = #tpu.dot_dimension_numbers<[2], [1], [1], [2], [0, 0, 0, 1, 1, 2], [0], [0]>} : vector<1x8x8xbf16>, vector<1x8x8xbf16>, vector<1x8x8xf32> -> vector<1x8x8xf32>
    "tpu.trace_stop"() : () -> ()
    %121 = vector.shape_cast %120 : vector<1x8x8xf32> to vector<8x8xf32>
    %122 = arith.truncf %121 : vector<8x8xf32> to vector<8x8xbf16>
    %c0_42 = arith.constant 0 : index
    %c3 = arith.constant 3 : index
    %c0_43 = arith.constant 0 : index
    %c0_44 = arith.constant 0 : index
    %123 = vector.load %arg5[%c0_42, %c3, %c0_43, %c0_44] : memref<2x4x8x32xbf16, #tpu.memory_space<vmem>>, vector<1x1x8x32xbf16>
    %124 = vector.shape_cast %123 : vector<1x1x8x32xbf16> to vector<8x32xbf16>
    %cst_45 = arith.constant dense<0.000000e+00> : vector<8x32xf32>
    %125 = tpu.matmul %122, %124, %cst_45 {dimension_numbers = #tpu.dot_dimension_numbers<[1], [0], [0], [1], [0, 0, 1, 1], [], []>} : vector<8x8xbf16>, vector<8x32xbf16>, vector<8x32xf32> -> vector<8x32xf32>
    %126 = arith.addf %98, %125 : vector<8x32xf32>
    %127 = vector.shape_cast %126 : vector<8x32xf32> to vector<1x8x32xf32>
    %c0_46 = arith.constant 0 : index
    %c0_47 = arith.constant 0 : index
    %c0_48 = arith.constant 0 : index
    %128 = vector.load %arg6[%c0_46, %c0_47, %c0_48] : memref<1x8x32xf32, #tpu.memory_space<vmem>>, vector<1x8x32xf32>
    tpu.vector_store %arg6[%c0_46, %c0_47, %c0_48], %127 {strides = array<i32>} : memref<1x8x32xf32, #tpu.memory_space<vmem>>, vector<1x8x32xf32>,
    %c1_49 = arith.constant 1 : index
    %c0_50 = arith.constant 0 : index
    %c0_51 = arith.constant 0 : index
    %129 = vector.load %arg3[%c1_49, %c0_50, %c0_51] : memref<2x32x32xbf16, #tpu.memory_space<vmem>>, vector<1x32x32xbf16>
    %130 = vector.shape_cast %129 : vector<1x32x32xbf16> to vector<32x32xbf16>
    %cst_52 = arith.constant dense<0.000000e+00> : vector<8x32xf32>
    %131 = tpu.matmul %2, %130, %cst_52 {dimension_numbers = #tpu.dot_dimension_numbers<[1], [0], [0], [1], [0, 0, 1, 1], [], []>} : vector<8x32xbf16>, vector<32x32xbf16>, vector<8x32xf32> -> vector<8x32xf32>
    %c1_53 = arith.constant 1 : index
    %c0_54 = arith.constant 0 : index
    %c0_55 = arith.constant 0 : index
    %132 = vector.load %arg4[%c1_53, %c0_54, %c0_55] : memref<2x32x64xbf16, #tpu.memory_space<vmem>>, vector<1x32x64xbf16>
    %133 = vector.shape_cast %132 : vector<1x32x64xbf16> to vector<32x64xbf16>
    %cst_56 = arith.constant dense<0.000000e+00> : vector<8x64xf32>
    %134 = tpu.matmul %5, %133, %cst_56 {dimension_numbers = #tpu.dot_dimension_numbers<[1], [0], [0], [1], [0, 0, 1, 1], [], []>} : vector<8x32xbf16>, vector<32x64xbf16>, vector<8x64xf32> -> vector<8x64xf32>
    %135 = vector.extract_strided_slice %134 {offsets = [0, 0], sizes = [8, 32], strides = [1, 1]} : vector<8x64xf32> to vector<8x32xf32>
    %136 = vector.extract_strided_slice %134 {offsets = [0, 32], sizes = [8, 32], strides = [1, 1]} : vector<8x64xf32> to vector<8x32xf32>
    %cst_57 = arith.constant 0.000000e+00 : f32
    %137 = vector.broadcast %cst_57 : f32 to vector<8x32xf32>
    %138 = vector.extract_strided_slice %131 {offsets = [0, 0], sizes = [8, 8], strides = [1, 1]} : vector<8x32xf32> to vector<8x8xf32>
    %139 = vector.shape_cast %138 : vector<8x8xf32> to vector<1x8x8xf32>
    %140 = arith.truncf %139 : vector<1x8x8xf32> to vector<1x8x8xbf16>
    %141 = vector.extract_strided_slice %135 {offsets = [0, 0], sizes = [8, 8], strides = [1, 1]} : vector<8x32xf32> to vector<8x8xf32>
    %142 = vector.shape_cast %141 : vector<8x8xf32> to vector<1x8x8xf32>
    %143 = arith.truncf %142 : vector<1x8x8xf32> to vector<1x8x8xbf16>
    %144 = vector.extract_strided_slice %136 {offsets = [0, 0], sizes = [8, 8], strides = [1, 1]} : vector<8x32xf32> to vector<8x8xf32>
    %145 = vector.shape_cast %144 : vector<8x8xf32> to vector<1x8x8xf32>
    %146 = arith.truncf %145 : vector<1x8x8xf32> to vector<1x8x8xbf16>
    "tpu.trace_start"() <{level = 10 : i32, message = "nqd,nkd->nqk"}> : () -> ()
    %cst_58 = arith.constant dense<0.000000e+00> : vector<1x8x8xf32>
    %147 = tpu.matmul %140, %143, %cst_58 {dimension_numbers = #tpu.dot_dimension_numbers<[2], [2], [1], [1], [0, 0, 0, 1, 1, 1], [0], [0]>} : vector<1x8x8xbf16>, vector<1x8x8xbf16>, vector<1x8x8xf32> -> vector<1x8x8xf32>
    "tpu.trace_stop"() : () -> ()
    %cst_59 = arith.constant dense<0xFF800000> : vector<1x8xf32>
    %148 = vector.multi_reduction <maximumf>, %147, %cst_59 [2] : vector<1x8x8xf32> to vector<1x8xf32>
    %149 = vector.shape_cast %148 : vector<1x8xf32> to vector<1x8x1xf32>
    %150 = vector.broadcast %149 : vector<1x8x1xf32> to vector<1x8x8xf32>
    %151 = arith.subf %147, %150 : vector<1x8x8xf32>
    %152 = math.exp %151 : vector<1x8x8xf32>
    %cst_60 = arith.constant dense<0.000000e+00> : vector<1x8xf32>
    %153 = vector.multi_reduction <add>, %152, %cst_60 [2] : vector<1x8x8xf32> to vector<1x8xf32>
    %154 = vector.shape_cast %153 : vector<1x8xf32> to vector<1x8x1xf32>
    %155 = tpu.reciprocal %154 : vector<1x8x1xf32> -> vector<1x8x1xf32>
    %156 = vector.broadcast %155 : vector<1x8x1xf32> to vector<1x8x8xf32>
    %157 = arith.mulf %152, %156 : vector<1x8x8xf32>
    %158 = arith.truncf %157 : vector<1x8x8xf32> to vector<1x8x8xbf16>
    "tpu.trace_start"() <{level = 10 : i32, message = "nqk,nkd->nqd"}> : () -> ()
    %cst_61 = arith.constant dense<0.000000e+00> : vector<1x8x8xf32>
    %159 = tpu.matmul %158, %146, %cst_61 {dimension_numbers = #tpu.dot_dimension_numbers<[2], [1], [1], [2], [0, 0, 0, 1, 1, 2], [0], [0]>} : vector<1x8x8xbf16>, vector<1x8x8xbf16>, vector<1x8x8xf32> -> vector<1x8x8xf32>
    "tpu.trace_stop"() : () -> ()
    %160 = vector.shape_cast %159 : vector<1x8x8xf32> to vector<8x8xf32>
    %161 = arith.truncf %160 : vector<8x8xf32> to vector<8x8xbf16>
    %c1_62 = arith.constant 1 : index
    %c0_63 = arith.constant 0 : index
    %c0_64 = arith.constant 0 : index
    %c0_65 = arith.constant 0 : index
    %162 = vector.load %arg5[%c1_62, %c0_63, %c0_64, %c0_65] : memref<2x4x8x32xbf16, #tpu.memory_space<vmem>>, vector<1x1x8x32xbf16>
    %163 = vector.shape_cast %162 : vector<1x1x8x32xbf16> to vector<8x32xbf16>
    %cst_66 = arith.constant dense<0.000000e+00> : vector<8x32xf32>
    %164 = tpu.matmul %161, %163, %cst_66 {dimension_numbers = #tpu.dot_dimension_numbers<[1], [0], [0], [1], [0, 0, 1, 1], [], []>} : vector<8x8xbf16>, vector<8x32xbf16>, vector<8x32xf32> -> vector<8x32xf32>
    %165 = arith.addf %137, %164 : vector<8x32xf32>
    %166 = vector.extract_strided_slice %131 {offsets = [0, 8], sizes = [8, 8], strides = [1, 1]} : vector<8x32xf32> to vector<8x8xf32>
    %167 = vector.shape_cast %166 : vector<8x8xf32> to vector<1x8x8xf32>
    %168 = arith.truncf %167 : vector<1x8x8xf32> to vector<1x8x8xbf16>
    %169 = vector.extract_strided_slice %135 {offsets = [0, 8], sizes = [8, 8], strides = [1, 1]} : vector<8x32xf32> to vector<8x8xf32>
    %170 = vector.shape_cast %169 : vector<8x8xf32> to vector<1x8x8xf32>
    %171 = arith.truncf %170 : vector<1x8x8xf32> to vector<1x8x8xbf16>
    %172 = vector.extract_strided_slice %136 {offsets = [0, 8], sizes = [8, 8], strides = [1, 1]} : vector<8x32xf32> to vector<8x8xf32>
    %173 = vector.shape_cast %172 : vector<8x8xf32> to vector<1x8x8xf32>
    %174 = arith.truncf %173 : vector<1x8x8xf32> to vector<1x8x8xbf16>
    "tpu.trace_start"() <{level = 10 : i32, message = "nqd,nkd->nqk"}> : () -> ()
    %cst_67 = arith.constant dense<0.000000e+00> : vector<1x8x8xf32>
    %175 = tpu.matmul %168, %171, %cst_67 {dimension_numbers = #tpu.dot_dimension_numbers<[2], [2], [1], [1], [0, 0, 0, 1, 1, 1], [0], [0]>} : vector<1x8x8xbf16>, vector<1x8x8xbf16>, vector<1x8x8xf32> -> vector<1x8x8xf32>
    "tpu.trace_stop"() : () -> ()
    %cst_68 = arith.constant dense<0xFF800000> : vector<1x8xf32>
    %176 = vector.multi_reduction <maximumf>, %175, %cst_68 [2] : vector<1x8x8xf32> to vector<1x8xf32>
    %177 = vector.shape_cast %176 : vector<1x8xf32> to vector<1x8x1xf32>
    %178 = vector.broadcast %177 : vector<1x8x1xf32> to vector<1x8x8xf32>
    %179 = arith.subf %175, %178 : vector<1x8x8xf32>
    %180 = math.exp %179 : vector<1x8x8xf32>
    %cst_69 = arith.constant dense<0.000000e+00> : vector<1x8xf32>
    %181 = vector.multi_reduction <add>, %180, %cst_69 [2] : vector<1x8x8xf32> to vector<1x8xf32>
    %182 = vector.shape_cast %181 : vector<1x8xf32> to vector<1x8x1xf32>
    %183 = tpu.reciprocal %182 : vector<1x8x1xf32> -> vector<1x8x1xf32>
    %184 = vector.broadcast %183 : vector<1x8x1xf32> to vector<1x8x8xf32>
    %185 = arith.mulf %180, %184 : vector<1x8x8xf32>
    %186 = arith.truncf %185 : vector<1x8x8xf32> to vector<1x8x8xbf16>
    "tpu.trace_start"() <{level = 10 : i32, message = "nqk,nkd->nqd"}> : () -> ()
    %cst_70 = arith.constant dense<0.000000e+00> : vector<1x8x8xf32>
    %187 = tpu.matmul %186, %174, %cst_70 {dimension_numbers = #tpu.dot_dimension_numbers<[2], [1], [1], [2], [0, 0, 0, 1, 1, 2], [0], [0]>} : vector<1x8x8xbf16>, vector<1x8x8xbf16>, vector<1x8x8xf32> -> vector<1x8x8xf32>
    "tpu.trace_stop"() : () -> ()
    %188 = vector.shape_cast %187 : vector<1x8x8xf32> to vector<8x8xf32>
    %189 = arith.truncf %188 : vector<8x8xf32> to vector<8x8xbf16>
    %c1_71 = arith.constant 1 : index
    %c1_72 = arith.constant 1 : index
    %c0_73 = arith.constant 0 : index
    %c0_74 = arith.constant 0 : index
    %190 = vector.load %arg5[%c1_71, %c1_72, %c0_73, %c0_74] : memref<2x4x8x32xbf16, #tpu.memory_space<vmem>>, vector<1x1x8x32xbf16>
    %191 = vector.shape_cast %190 : vector<1x1x8x32xbf16> to vector<8x32xbf16>
    %cst_75 = arith.constant dense<0.000000e+00> : vector<8x32xf32>
    %192 = tpu.matmul %189, %191, %cst_75 {dimension_numbers = #tpu.dot_dimension_numbers<[1], [0], [0], [1], [0, 0, 1, 1], [], []>} : vector<8x8xbf16>, vector<8x32xbf16>, vector<8x32xf32> -> vector<8x32xf32>
    %193 = arith.addf %165, %192 : vector<8x32xf32>
    %194 = vector.extract_strided_slice %131 {offsets = [0, 16], sizes = [8, 8], strides = [1, 1]} : vector<8x32xf32> to vector<8x8xf32>
    %195 = vector.shape_cast %194 : vector<8x8xf32> to vector<1x8x8xf32>
    %196 = arith.truncf %195 : vector<1x8x8xf32> to vector<1x8x8xbf16>
    %197 = vector.extract_strided_slice %135 {offsets = [0, 16], sizes = [8, 8], strides = [1, 1]} : vector<8x32xf32> to vector<8x8xf32>
    %198 = vector.shape_cast %197 : vector<8x8xf32> to vector<1x8x8xf32>
    %199 = arith.truncf %198 : vector<1x8x8xf32> to vector<1x8x8xbf16>
    %200 = vector.extract_strided_slice %136 {offsets = [0, 16], sizes = [8, 8], strides = [1, 1]} : vector<8x32xf32> to vector<8x8xf32>
    %201 = vector.shape_cast %200 : vector<8x8xf32> to vector<1x8x8xf32>
    %202 = arith.truncf %201 : vector<1x8x8xf32> to vector<1x8x8xbf16>
    "tpu.trace_start"() <{level = 10 : i32, message = "nqd,nkd->nqk"}> : () -> ()
    %cst_76 = arith.constant dense<0.000000e+00> : vector<1x8x8xf32>
    %203 = tpu.matmul %196, %199, %cst_76 {dimension_numbers = #tpu.dot_dimension_numbers<[2], [2], [1], [1], [0, 0, 0, 1, 1, 1], [0], [0]>} : vector<1x8x8xbf16>, vector<1x8x8xbf16>, vector<1x8x8xf32> -> vector<1x8x8xf32>
    "tpu.trace_stop"() : () -> ()
    %cst_77 = arith.constant dense<0xFF800000> : vector<1x8xf32>
    %204 = vector.multi_reduction <maximumf>, %203, %cst_77 [2] : vector<1x8x8xf32> to vector<1x8xf32>
    %205 = vector.shape_cast %204 : vector<1x8xf32> to vector<1x8x1xf32>
    %206 = vector.broadcast %205 : vector<1x8x1xf32> to vector<1x8x8xf32>
    %207 = arith.subf %203, %206 : vector<1x8x8xf32>
    %208 = math.exp %207 : vector<1x8x8xf32>
    %cst_78 = arith.constant dense<0.000000e+00> : vector<1x8xf32>
    %209 = vector.multi_reduction <add>, %208, %cst_78 [2] : vector<1x8x8xf32> to vector<1x8xf32>
    %210 = vector.shape_cast %209 : vector<1x8xf32> to vector<1x8x1xf32>
    %211 = tpu.reciprocal %210 : vector<1x8x1xf32> -> vector<1x8x1xf32>
    %212 = vector.broadcast %211 : vector<1x8x1xf32> to vector<1x8x8xf32>
    %213 = arith.mulf %208, %212 : vector<1x8x8xf32>
    %214 = arith.truncf %213 : vector<1x8x8xf32> to vector<1x8x8xbf16>
    "tpu.trace_start"() <{level = 10 : i32, message = "nqk,nkd->nqd"}> : () -> ()
    %cst_79 = arith.constant dense<0.000000e+00> : vector<1x8x8xf32>
    %215 = tpu.matmul %214, %202, %cst_79 {dimension_numbers = #tpu.dot_dimension_numbers<[2], [1], [1], [2], [0, 0, 0, 1, 1, 2], [0], [0]>} : vector<1x8x8xbf16>, vector<1x8x8xbf16>, vector<1x8x8xf32> -> vector<1x8x8xf32>
    "tpu.trace_stop"() : () -> ()
    %216 = vector.shape_cast %215 : vector<1x8x8xf32> to vector<8x8xf32>
    %217 = arith.truncf %216 : vector<8x8xf32> to vector<8x8xbf16>
    %c1_80 = arith.constant 1 : index
    %c2_81 = arith.constant 2 : index
    %c0_82 = arith.constant 0 : index
    %c0_83 = arith.constant 0 : index
    %218 = vector.load %arg5[%c1_80, %c2_81, %c0_82, %c0_83] : memref<2x4x8x32xbf16, #tpu.memory_space<vmem>>, vector<1x1x8x32xbf16>
    %219 = vector.shape_cast %218 : vector<1x1x8x32xbf16> to vector<8x32xbf16>
    %cst_84 = arith.constant dense<0.000000e+00> : vector<8x32xf32>
    %220 = tpu.matmul %217, %219, %cst_84 {dimension_numbers = #tpu.dot_dimension_numbers<[1], [0], [0], [1], [0, 0, 1, 1], [], []>} : vector<8x8xbf16>, vector<8x32xbf16>, vector<8x32xf32> -> vector<8x32xf32>
    %221 = arith.addf %193, %220 : vector<8x32xf32>
    %222 = vector.extract_strided_slice %131 {offsets = [0, 24], sizes = [8, 8], strides = [1, 1]} : vector<8x32xf32> to vector<8x8xf32>
    %223 = vector.shape_cast %222 : vector<8x8xf32> to vector<1x8x8xf32>
    %224 = arith.truncf %223 : vector<1x8x8xf32> to vector<1x8x8xbf16>
    %225 = vector.extract_strided_slice %135 {offsets = [0, 24], sizes = [8, 8], strides = [1, 1]} : vector<8x32xf32> to vector<8x8xf32>
    %226 = vector.shape_cast %225 : vector<8x8xf32> to vector<1x8x8xf32>
    %227 = arith.truncf %226 : vector<1x8x8xf32> to vector<1x8x8xbf16>
    %228 = vector.extract_strided_slice %136 {offsets = [0, 24], sizes = [8, 8], strides = [1, 1]} : vector<8x32xf32> to vector<8x8xf32>
    %229 = vector.shape_cast %228 : vector<8x8xf32> to vector<1x8x8xf32>
    %230 = arith.truncf %229 : vector<1x8x8xf32> to vector<1x8x8xbf16>
    "tpu.trace_start"() <{level = 10 : i32, message = "nqd,nkd->nqk"}> : () -> ()
    %cst_85 = arith.constant dense<0.000000e+00> : vector<1x8x8xf32>
    %231 = tpu.matmul %224, %227, %cst_85 {dimension_numbers = #tpu.dot_dimension_numbers<[2], [2], [1], [1], [0, 0, 0, 1, 1, 1], [0], [0]>} : vector<1x8x8xbf16>, vector<1x8x8xbf16>, vector<1x8x8xf32> -> vector<1x8x8xf32>
    "tpu.trace_stop"() : () -> ()
    %cst_86 = arith.constant dense<0xFF800000> : vector<1x8xf32>
    %232 = vector.multi_reduction <maximumf>, %231, %cst_86 [2] : vector<1x8x8xf32> to vector<1x8xf32>
    %233 = vector.shape_cast %232 : vector<1x8xf32> to vector<1x8x1xf32>
    %234 = vector.broadcast %233 : vector<1x8x1xf32> to vector<1x8x8xf32>
    %235 = arith.subf %231, %234 : vector<1x8x8xf32>
    %236 = math.exp %235 : vector<1x8x8xf32>
    %cst_87 = arith.constant dense<0.000000e+00> : vector<1x8xf32>
    %237 = vector.multi_reduction <add>, %236, %cst_87 [2] : vector<1x8x8xf32> to vector<1x8xf32>
    %238 = vector.shape_cast %237 : vector<1x8xf32> to vector<1x8x1xf32>
    %239 = tpu.reciprocal %238 : vector<1x8x1xf32> -> vector<1x8x1xf32>
    %240 = vector.broadcast %239 : vector<1x8x1xf32> to vector<1x8x8xf32>
    %241 = arith.mulf %236, %240 : vector<1x8x8xf32>
    %242 = arith.truncf %241 : vector<1x8x8xf32> to vector<1x8x8xbf16>
    "tpu.trace_start"() <{level = 10 : i32, message = "nqk,nkd->nqd"}> : () -> ()
    %cst_88 = arith.constant dense<0.000000e+00> : vector<1x8x8xf32>
    %243 = tpu.matmul %242, %230, %cst_88 {dimension_numbers = #tpu.dot_dimension_numbers<[2], [1], [1], [2], [0, 0, 0, 1, 1, 2], [0], [0]>} : vector<1x8x8xbf16>, vector<1x8x8xbf16>, vector<1x8x8xf32> -> vector<1x8x8xf32>
    "tpu.trace_stop"() : () -> ()
    %244 = vector.shape_cast %243 : vector<1x8x8xf32> to vector<8x8xf32>
    %245 = arith.truncf %244 : vector<8x8xf32> to vector<8x8xbf16>
    %c1_89 = arith.constant 1 : index
    %c3_90 = arith.constant 3 : index
    %c0_91 = arith.constant 0 : index
    %c0_92 = arith.constant 0 : index
    %246 = vector.load %arg5[%c1_89, %c3_90, %c0_91, %c0_92] : memref<2x4x8x32xbf16, #tpu.memory_space<vmem>>, vector<1x1x8x32xbf16>
    %247 = vector.shape_cast %246 : vector<1x1x8x32xbf16> to vector<8x32xbf16>
    %cst_93 = arith.constant dense<0.000000e+00> : vector<8x32xf32>
    %248 = tpu.matmul %245, %247, %cst_93 {dimension_numbers = #tpu.dot_dimension_numbers<[1], [0], [0], [1], [0, 0, 1, 1], [], []>} : vector<8x8xbf16>, vector<8x32xbf16>, vector<8x32xf32> -> vector<8x32xf32>
    %249 = arith.addf %221, %248 : vector<8x32xf32>
    %250 = vector.shape_cast %249 : vector<8x32xf32> to vector<1x8x32xf32>
    %c0_94 = arith.constant 0 : index
    %c0_95 = arith.constant 0 : index
    %c0_96 = arith.constant 0 : index
    %251 = vector.load %arg7[%c0_94, %c0_95, %c0_96] : memref<1x8x32xf32, #tpu.memory_space<vmem>>, vector<1x8x32xf32>
    tpu.vector_store %arg7[%c0_94, %c0_95, %c0_96], %250 {strides = array<i32>} : memref<1x8x32xf32, #tpu.memory_space<vmem>>, vector<1x8x32xf32>,
    return
  }
  func.func @transform_0(%arg0: i32) -> (i32, i32, i32) {
    %c0_i32 = arith.constant 0 : i32
    %c0_i32_0 = arith.constant 0 : i32
    %c0_i32_1 = arith.constant 0 : i32
    return %arg0, %c0_i32, %c0_i32_0 : i32, i32, i32
  }
  func.func @transform_1(%arg0: i32) -> (i32, i32, i32) {
    %c0_i32 = arith.constant 0 : i32
    %c0_i32_0 = arith.constant 0 : i32
    %c0_i32_1 = arith.constant 0 : i32
    return %arg0, %c0_i32, %c0_i32_0 : i32, i32, i32
  }
  func.func @transform_2(%arg0: i32) -> (i32, i32, i32) {
    %c0_i32 = arith.constant 0 : i32
    %c0_i32_0 = arith.constant 0 : i32
    %c0_i32_1 = arith.constant 0 : i32
    %c0_i32_2 = arith.constant 0 : i32
    return %c0_i32, %c0_i32_0, %c0_i32_1 : i32, i32, i32
  }
  func.func @transform_3(%arg0: i32) -> (i32, i32, i32) {
    %c0_i32 = arith.constant 0 : i32
    %c0_i32_0 = arith.constant 0 : i32
    %c0_i32_1 = arith.constant 0 : i32
    %c0_i32_2 = arith.constant 0 : i32
    return %c0_i32, %c0_i32_0, %c0_i32_1 : i32, i32, i32
  }
  func.func @transform_4(%arg0: i32) -> (i32, i32, i32, i32) {
    %c0_i32 = arith.constant 0 : i32
    %c0_i32_0 = arith.constant 0 : i32
    %c0_i32_1 = arith.constant 0 : i32
    %c0_i32_2 = arith.constant 0 : i32
    %c0_i32_3 = arith.constant 0 : i32
    return %c0_i32, %c0_i32_0, %c0_i32_1, %c0_i32_2 : i32, i32, i32, i32
  }
  func.func @transform_5(%arg0: i32) -> (i32, i32, i32) {
    %c0_i32 = arith.constant 0 : i32
    %c0_i32_0 = arith.constant 0 : i32
    %c0_i32_1 = arith.constant 0 : i32
    return %arg0, %c0_i32, %c0_i32_0 : i32, i32, i32
  }
  func.func @transform_6(%arg0: i32) -> (i32, i32, i32) {
    %c0_i32 = arith.constant 0 : i32
    %c0_i32_0 = arith.constant 0 : i32
    %c0_i32_1 = arith.constant 0 : i32
    return %arg0, %c0_i32, %c0_i32_0 : i32, i32, i32
  }
}

</mosaic_0001>

<bundles_post_ra>
// kernel: bicross_attention.1
= control target key start
LH: loop header
LB: loop body
LE: loop exit
PB: predicated region body
PF: predicated region fallthrough
CT: control target
= control target key end

     0   :  { %s3381_s0 = inlined_call_operand.hbm [shape: f32[2,8,32], index: 0, kind: input, shape index: {}]   ;;  %s3382_s1 = inlined_call_operand.hbm [shape: f32[2,8,32], index: 1, kind: input, shape index: {}]   ;;  %s3383_s2 = inlined_call_operand.hbm [shape: bf16[2,32,32], index: 2, kind: input, shape index: {}]   ;;  %s3384_s3 = inlined_call_operand.hbm [shape: bf16[2,32,64], index: 3, kind: input, shape index: {}]   ;;  %s3385_s4 = inlined_call_operand.hbm [shape: bf16[2,4,8,32], index: 4, kind: input, shape index: {}]   ;;  %s3386_s5 = inlined_call_operand.hbm [shape: f32[2,8,32], index: 5, kind: output, shape index: {0}]   ;;  %s3387_s6 = inlined_call_operand.hbm [shape: f32[2,8,32], index: 6, kind: output, shape index: {1}]  }
   0x1   :  { %3392 = sst [smem:[#allocation20_spill]] %s3383_s2 }
   0x2   :  { %3393 = sst [smem:[#allocation21_spill]] %s3384_s3 }
   0x3   :  { %3394 = sst [smem:[#allocation22_spill]] %s3385_s4 }
   0x4   :  { %12 = vsyncpa [#allocation3], 0 }
   0x5   :  { %14 = vsyncpa [#allocation3 + $0x1], 0 }
   0x6   :  { %15 = vsyncpa [#allocation6], 0 }
   0x7   :  { %17 = vsyncpa [#allocation6 + $0x1], 0 }
   0x8   :  { %18 = vsyncpa [#allocation9], 0 }
   0x9   :  { %19 = vsyncpa [#allocation4], 0 }
   0xa   :  { %21 = vsyncpa [#allocation4 + $0x1], 0 }
   0xb   :  { %22 = vsyncpa [#allocation13], 0 }
   0xc   :  { %24 = vsyncpa [#allocation13 + $0x1], 0  ;;  %s2827_s21 = smov 0   ;;  %s2829_s22 = smov 0  }
   0xd   :  { %s2831_s23 = smov 0   ;;  %s2833_s24 = smov 0  }
   0xe LB: > { %s2848_s25 = sadd.s32 4294967295, %s2772_s24   ;;  %s2060_s26 = sadd.s32 4294967294, %s2772_s24   ;;  %s2772_s24 = sphi %s2833_s24, %s3418_s24   ;;  %s2768_s23 = sphi %s2831_s23, %s3417_s23   ;;  %s2764_s22 = sphi %s2829_s22, %s3416_s22   ;;  %s2760_s21 = sphi %s2827_s21, %s3415_s21  }
   0xf   : > { %p50_p0 = scmp.ne.s32.totalorder %s2764_s22, %s2760_s21  ;;  %p3388_p1 = scmp.eq.s32.totalorder %s2848_s25, 0 }
  0x10   : > { %p169_p3 = scmp.eq.s32.totalorder %s2060_s26, 1  ;;  %p2061_p5 = scmp.ge.s32.totalorder %s2772_s24, 1 }
  0x11   : > { %p2857_p4 = por %p3388_p1, %p50_p0  ;;  %p202_p7 = scmp.lt.s32.totalorder %s2772_s24, 3 }
  0x12   : > { %p2862_p6 = por %p169_p3, %p50_p0  ;;  %s2774_s30 = smov [#allocation7]  }
  0x13   : > { %s3395_s27 = scalar_select %p2857_p4, 1, 0 }
  0x14   : > { %s3396_s28 = scalar_select %p2862_p6, 1, 0 }
  0x15   : > { %p2867_p8 = pnand %p2061_p5, %p202_p7  ;;  %s214_s7 = sshll.u32 %s2774_s30, 4  ;;  %s2871_s7 = int_to_ptr.vmem [resolvable:$true] %s214_s7 }
  0x16   : > { %s2775_s9 = smov [#allocation8]   ;;  %s2776_s11 = smov [#allocation10]  }
  0x17   : > { %s3397_s29 = scalar_select %p2867_p8, 1, 0 }
  0x18   : > { %p2400_p9 = pneg %p2867_p8  ;;  %s227_s10 = sshll.u32 %s2775_s9, 4  ;;  %s2882_s10 = int_to_ptr.vmem [resolvable:$true] %s227_s10 }
  0x19   : > { %s2884_s12 = sshll.u32 %s2776_s11, 4  ;;  %s3399_s2 = sld [smem:[#allocation20_spill]]  ;;  %s241_s12 = int_to_ptr.vmem [resolvable:$true] %s2884_s12 }
  0x1a   : > { %p2878_p11 = pnand %p2400_p9, %p3388_p1 }
  0x1c   : > { %p2894_p13 = pneg %p2878_p11 }
  0x1f   : > { %s2518_s15 = scalar_lea.hbm %s3399_s2, 512 }
  0x20   : > { %p2519_p12 = scmp.ne.s32.totalorder %s3399_s2, %s2518_s15  ;;  %p2525_p5 = scmp.lt.u32.totalorder %s2518_s15, %s3399_s2 }
  0x22   : > { %p2521_p0 = pnand %p2894_p13, %p2519_p12 }
  0x24   : > { %p2522_p3 = pneg %p2521_p0 }
  0x26   : > { %p2527_p7 = pnand %p2525_p5, %p2522_p3 }
  0x28   : > { %2530 = shalt.err (!%p2527_p7)
}
  0x29   : > { %s2531_s26 = scalar_lea.vmem %s2871_s7, 512  ;;  %p2539_p2 = scmp.lt.s32.totalorder %s2871_s7, %s2871_s7 }
  0x2a   : > { %p2532_p9 = scmp.ne.s32.totalorder %s2871_s7, %s2531_s26  ;;  %p2540_p6 = scmp.lt.s32.totalorder %s2531_s26, %s2531_s26 }
  0x2c   : > { %p2534_p10 = pnand %p2532_p9, %p2894_p13  ;;  %p2541_p12 = por %p2540_p6, %p2539_p2 }
  0x2e   : > { %p2535_p1 = pneg %p2534_p10 }
  0x30   : > { %p2542_p0 = pnand %p2541_p12, %p2535_p1 }
  0x32   : > { %2545 = shalt.err (!%p2542_p0)
}
  0x33   : > { %s2777_s30 = smov 64   ;;  %s2778_s9 = smov 4  }
  0x34   : > { %2403 = dma.hbm_to_vmem [thread:$0]  (!%p2878_p11), %s3399_s2, 512, %s2871_s7, [#allocation6], %s2777_s30, %s2777_s30, %s2778_s9  }
  0x35   : > { %s3401_s3 = sld [smem:[#allocation21_spill]] }
  0x3b   : > { %s2546_s16 = scalar_lea.hbm %s3401_s3, 512 }
  0x3c   : > { %p2547_p1 = scmp.ne.s32.totalorder %s3401_s3, %s2546_s16  ;;  %p2553_p10 = scmp.lt.u32.totalorder %s2546_s16, %s3401_s3 }
  0x3e   : > { %p2549_p2 = pnand %p2547_p1, %p2894_p13 }
  0x40   : > { %p2550_p6 = pneg %p2549_p2 }
  0x42   : > { %p2555_p3 = pnand %p2553_p10, %p2550_p6 }
  0x44   : > { %2558 = shalt.err (!%p2555_p3)
}
  0x45   : > { %s2559_s7 = scalar_lea.vmem %s2882_s10, 512  ;;  %p2567_p12 = scmp.lt.s32.totalorder %s2882_s10, %s2882_s10 }
  0x46   : > { %p2560_p5 = scmp.ne.s32.totalorder %s2882_s10, %s2559_s7  ;;  %p2568_p0 = scmp.lt.s32.totalorder %s2559_s7, %s2559_s7 }
  0x48   : > { %p2562_p7 = pnand %p2560_p5, %p2894_p13  ;;  %p2569_p1 = por %p2568_p0, %p2567_p12 }
  0x4a   : > { %p2563_p9 = pneg %p2562_p7 }
  0x4c   : > { %p2570_p2 = pnand %p2569_p1, %p2563_p9 }
  0x4e   : > { %2573 = shalt.err (!%p2570_p2)
}
  0x4f   : > { %2406 = dma.hbm_to_vmem [thread:$0]  (!%p2878_p11), %s3401_s3, 512, %s2882_s10, [#allocation9], %s2777_s30, %s2777_s30, %s2778_s9  }
  0x50   : > { %s3402_s4 = sld [smem:[#allocation22_spill]] }
  0x56   : > { %s2574_s16 = scalar_lea.hbm %s3402_s4, 512 }
  0x57   : > { %p2575_p6 = scmp.ne.s32.totalorder %s3402_s4, %s2574_s16  ;;  %p2581_p5 = scmp.lt.u32.totalorder %s2574_s16, %s3402_s4 }
  0x59   : > { %p2577_p10 = pnand %p2575_p6, %p2894_p13 }
  0x5b   : > { %p2578_p3 = pneg %p2577_p10 }
  0x5d   : > { %p2583_p7 = pnand %p2581_p5, %p2578_p3 }
  0x5f   : > { %2586 = shalt.err (!%p2583_p7)
}
  0x60   : > { %s2587_s7 = scalar_lea.vmem %s241_s12, 512  ;;  %p2595_p1 = scmp.lt.s32.totalorder %s241_s12, %s241_s12 }
  0x61   : > { %p2588_p9 = scmp.ne.s32.totalorder %s241_s12, %s2587_s7  ;;  %p2596_p2 = scmp.lt.s32.totalorder %s2587_s7, %s2587_s7 }
  0x63   : > { %p2590_p12 = pnand %p2588_p9, %p2894_p13  ;;  %p2597_p4 = por %p2596_p2, %p2595_p1 }
  0x65   : > { %p2591_p0 = pneg %p2590_p12 }
  0x67   : > { %p2598_p8 = pnand %p2597_p4, %p2591_p0 }
  0x69   : > { %2601 = shalt.err (!%p2598_p8)
}
  0x6a   : > { %2409 = dma.hbm_to_vmem [thread:$0]  (!%p2878_p11), %s3402_s4, 512, %s241_s12, [#allocation9], %s2777_s30, %s2777_s30, %s2778_s9  }
  0x6b   : > { %s2967_s18 = sadd.s32 1, %s2772_s24   ;;  %s37_s13 = sadd.s32 1, %s2768_s23 }
  0x6c   : > { %s34_s8 = ssub.s32 %s2772_s24, %s2967_s18  ;;  %p44_p8 = scmp.ne.s32.totalorder %s2768_s23, %s2764_s22 }
  0x6d   : > { %p35_p4 = scmp.eq.s32.totalorder %s34_s8, 0  ;;  %p45_p13 = scmp.eq.s32.totalorder %s2772_s24, 0 }
  0x6e   : > { %p2427_p6 = scmp.lt.s32.totalorder %s2772_s24, 2  ;;  %p3403_p3 = scmp.eq.s32.totalorder %s2848_s25, 1 }
  0x6f   : > { %s2977_s14 = scalar_select %p35_p4, %s2768_s23, %s37_s13  }
  0x70   : > { %p46_p10 = por %p45_p13, %p44_p8  ;;  %p2981_p5 = por %p3403_p3, %p44_p8 }
  0x71   : > { %s254_s16 = sand.u32 1, %s2768_s23   ;;  %s2067_s17 = sshll.u32 %s2772_s24, 7 }
  0x72   : > { %s3404_s15 = scalar_select %p2981_p5, 1, 0 }
  0x73   : > { %s2987_s12 = sshll.u32 %s254_s16, 3  ;;  %s2992_s19 = scalar_lea.hbm %s3381_s0, %s2067_s17 }
  0x74   : > { %s258_s20 = scalar_lea.vmem [#allocation2], %s2987_s12  ;;  %p2995_p11 = pnand %p2427_p6, %p46_p10 }
  0x75   : > { %s265_s26 = sshll.u32 %s258_s20, 4  ;;  %s3004_s8 = scalar_lea.hbm %s3382_s1, %s2067_s17  ;;  %s2999_s26 = int_to_ptr.vmem [resolvable:$true] %s265_s26 }
  0x76   : > { %s255_s13 = scalar_lea.sflag [#allocation3], %s254_s16  ;;  %s2602_s30 = scalar_lea.hbm %s2992_s19, 128 }
  0x77   : > { %p2603_p7 = scmp.ne.s32.totalorder %s2992_s19, %s2602_s30  ;;  %p2604_p9 = pneg %p2995_p11 }
  0x78   : > { %s2607_s2 = scalar_lea.hbm %s3381_s0, 256  ;;  %p2608_p1 = scmp.lt.u32.totalorder %s2992_s19, %s3381_s0 }
  0x79   : > { %p2605_p12 = pnand %p2604_p9, %p2603_p7  ;;  %p2609_p2 = scmp.lt.u32.totalorder %s2607_s2, %s2602_s30 }
  0x7a   : > { %p2611_p8 = scmp.lt.u32.totalorder %s2602_s30, %s2992_s19 }
  0x7b   : > { %p2606_p0 = pneg %p2605_p12  ;;  %p2610_p4 = por %p2609_p2, %p2608_p1 }
  0x7d   : > { %p2612_p13 = por %p2611_p8, %p2610_p4 }
  0x7f   : > { %p2613_p6 = pnand %p2612_p13, %p2606_p0 }
  0x81   : > { %2616 = shalt.err (!%p2613_p6)
}
  0x82   : > { %s2617_s16 = scalar_lea.vmem %s2999_s26, 128  ;;  %s2779_s17 = smov [#allocation2]  }
  0x83   : > { %p2618_p10 = scmp.ne.s32.totalorder %s2999_s26, %s2617_s16  ;;  %s2622_s10 = sshll.u32 %s2779_s17, 4  ;;  %s2623_s10 = int_to_ptr.vmem [resolvable:$false] %s2622_s10 }
  0x84   : > { %s2624_s3 = scalar_lea.vmem %s2623_s10, 256  ;;  %p2625_p12 = scmp.lt.s32.totalorder %s2999_s26, %s2623_s10 }
  0x85   : > { %p2620_p3 = pnand %p2618_p10, %p2604_p9  ;;  %p2626_p1 = scmp.lt.s32.totalorder %s2624_s3, %s2617_s16 }
  0x87   : > { %p2621_p7 = pneg %p2620_p3  ;;  %p2627_p2 = por %p2626_p1, %p2625_p12 }
  0x89   : > { %p2628_p4 = pnand %p2627_p2, %p2621_p7 }
  0x8b   : > { %2631 = shalt.err (!%p2628_p4)
}
  0x8c   : > { %2413 = dma.hbm_to_vmem [thread:$0]  (!%p2995_p11), %s2992_s19, 128, %s2999_s26, %s255_s13  }
  0x8d   : > { %s272_s2 = sand.u32 1, %s2772_s24   ;;  %s276_s4 = scalar_lea.vmem [#allocation5], %s2987_s12 }
  0x8e   : > { %s283_s11 = sshll.u32 %s276_s4, 4  ;;  %s273_s30 = scalar_lea.sflag [#allocation6], %s272_s2  ;;  %s284_s11 = int_to_ptr.vmem [resolvable:$true] %s283_s11 }
  0x8f   : > { %s2632_s9 = scalar_lea.hbm %s3004_s8, 128  ;;  %s2637_s17 = scalar_lea.hbm %s3382_s1, 256 }
  0x90   : > { %p2633_p0 = scmp.ne.s32.totalorder %s3004_s8, %s2632_s9  ;;  %p2638_p6 = scmp.lt.u32.totalorder %s3004_s8, %s3382_s1 }
  0x91   : > { %p2639_p10 = scmp.lt.u32.totalorder %s2637_s17, %s2632_s9  ;;  %p2641_p7 = scmp.lt.u32.totalorder %s2632_s9, %s3004_s8 }
  0x92   : > { %p2635_p8 = pnand %p2633_p0, %p2604_p9 }
  0x93   : > { %p2640_p3 = por %p2639_p10, %p2638_p6 }
  0x94   : > { %p2636_p13 = pneg %p2635_p8 }
  0x95   : > { %p2642_p12 = por %p2641_p7, %p2640_p3 }
  0x97   : > { %p2643_p1 = pnand %p2642_p12, %p2636_p13 }
  0x99   : > { %2646 = shalt.err (!%p2643_p1)
}
  0x9a   : > { %s2647_s12 = scalar_lea.vmem %s284_s11, 128  ;;  %s2780_s19 = smov [#allocation5]  }
  0x9b   : > { %p2648_p2 = scmp.ne.s32.totalorder %s284_s11, %s2647_s12  ;;  %s2652_s26 = sshll.u32 %s2780_s19, 4  ;;  %s2653_s26 = int_to_ptr.vmem [resolvable:$false] %s2652_s26 }
  0x9c   : > { %s2654_s13 = scalar_lea.vmem %s2653_s26, 256  ;;  %p2655_p8 = scmp.lt.s32.totalorder %s284_s11, %s2653_s26 }
  0x9d   : > { %p2650_p4 = pnand %p2648_p2, %p2604_p9  ;;  %p2656_p5 = scmp.lt.s32.totalorder %s2654_s13, %s2647_s12 }
  0x9f   : > { %p2651_p0 = pneg %p2650_p4  ;;  %p2657_p6 = por %p2656_p5, %p2655_p8 }
  0xa1   : > { %p2658_p10 = pnand %p2657_p6, %p2651_p0 }
  0xa3   : > { %2661 = shalt.err (!%p2658_p10)
}
  0xa4   : > { %2416 = dma.hbm_to_vmem [thread:$0]  (!%p2995_p11), %s3004_s8, 128, %s284_s11, %s273_s30  }
  0xa5   : > { %p3406_p13 = scmp.ne.s32.totalorder %s3397_s29, 0 }
  0xa6   : > { %s3055_s2 = sand.u32 (!%p3406_p13), 1, %s2764_s22   ;;  %p3407_p5 = scmp.ne.s32.totalorder (!%p3406_p13), %s3395_s27, 0 }
  0xa7   : > { %292 = sbr.rel (%p3406_p13) target bundleno = 4456 (0x1168), region = 40  ;;  %s3058_s4 = sshll.u32 (!%p3406_p13), %s3055_s2, 3 }
  0xa8   : > { %s295_s9 = scalar_lea.sflag (!%p3406_p13), [#allocation3], %s3055_s2  ;;  %s298_s20 = scalar_lea.vmem (!%p3406_p13), [#allocation2], %s3058_s4 }
  0xae   : > { %2735 = dma.done.wait (%p3407_p5), %s295_s9, 128  }
  0xaf   : > { %2737 = vsyncadd (%p3407_p5), %s295_s9, 4294967168  ;;  %s303_s29 = sand.u32 1, %s2848_s25   ;;  %s307_s8 = scalar_lea.vmem [#allocation5], %s3058_s4 }
  0xb0   : > { %s304_s7 = scalar_lea.sflag [#allocation6], %s303_s29 }
  0xb1   : > { %2739 = dma.done.wait (%p3407_p5), %s304_s7, 128  }
  0xb2   : > { %2741 = vsyncadd (%p3407_p5), %s304_s7, 4294967168  ;;  %p3408_p11 = scmp.eq.s32.totalorder %s2848_s25, 0 }
  0xb4   : > { %2743 = dma.done.wait (%p3408_p11), [#allocation6], 512   ;;  %p3409_p9 = pmov %p3408_p11 }
  0xb6   : > { %2745 = vsyncadd (%p3409_p9), [#allocation6], 4294966784  ;;  %p3410_p3 = pmov %p3409_p9 }
  0xb8   : > { %2747 = dma.done.wait (%p3410_p3), [#allocation9], 1024   ;;  %p3411_p7 = pmov %p3410_p3 }
  0xb9   : > { %v2781_v0 = vmov 0.0   ;;  %vm2782_vm0 = vmmov 0   ;;  %v2478_v1 = vld [vmem:[#allocation7] sm:$0xff]   ;;  %v2479_v2 = vld [vmem:[#allocation7 + $0x8] sm:$0xff]   ;;  %v361_v3 = vld [vmem:[%s307_s8] sm:$0xff]  ;;  %vm379_vm1 = vcmask 261120  }
  0xba   : > { %2749 = vsyncadd (%p3411_p7), [#allocation9], 4294966272  ;;  %2180 = vmatprep.subr.bf16.mxu1 %v2781_v0  ;;  %2184 = vmatprep.mubr.msk.bf16.mxu1 %vm2782_vm0, %v2781_v0  ;;  %v2480_v4 = vld [vmem:[#allocation8] sm:$0xff]   ;;  %v3087_v5 = vpack.c.bf16 %v361_v3, %v361_v3  ;;  %v2481_v6 = vld [vmem:[#allocation8 + $0x8] sm:$0xff]   ;;  %vm484_vm2 = vcmask 64512   ;;  %s2783_s27 = smov 120  }
  0xbb   : > { %2196 = vmatprep.subr.bf16.mxu0 %v2781_v0  ;;  %2198 = vmatprep.mubr.msk.bf16.mxu0 %vm2782_vm0, %v2781_v0  ;;  %v359_v7 = vld [vmem:[%s298_s20] sm:$0xff]  ;;  %s2784_s11 = smov 96   ;;  %s2785_s30 = smov 88   ;;  %vm549_vm3 = vcmask 1043456  }
  0xbc   : > { %2181 = vmatpush3.bf16.msra.mxu1 %v2478_v1  ;;  %v3097_v8 = vpack.c.bf16 %v359_v7, %v359_v7  ;;  %s2786_s16 = smov 112   ;;  %v708_v58 = vld [vmem:[#allocation10 + $0x4] sm:$0xf]  ;;  %v594_v1 = vld [vmem:[#allocation10] sm:$0xf]  ;;  %s2787_s17 = smov 80  }
  0xbd   : > { %2182 = vmatprep.subr.bf16.mxu1 %v2781_v0  ;;  %v713_v59 = vsel %vm549_vm3, %v708_v58, 0  ;;  %s2788_s10 = smov 104   ;;  %s2789_s3 = smov 72  }
  0xbe   : > { %s350_s12 = scalar_lea.vmem [#allocation11], %s3058_s4  ;;  %s2116_s19 = sshll.u32 %s2848_s25, 7 }
  0xbf   : > { %s1894_s26 = sshll.u32 %s350_s12, 4  ;;  %s3310_s20 = scalar_lea.hbm %s3386_s5, %s2116_s19  ;;  %s1895_s26 = int_to_ptr.vmem [resolvable:$true] %s1894_s26 }
  0xc0   : > { %2183 = vmatpush3.bf16.msra.mxu1 %v2479_v2  ;;  %s1876_s29 = scalar_lea.sflag [#allocation4], %s3055_s2  ;;  %s2662_s7 = scalar_lea.vmem %s1895_s26, 128 }
  0xc1   : > { %2188 = vmatprep.subr.bf16.mxu1 %v2781_v0  ;;  %p2663_p12 = scmp.ne.s32.totalorder %s1895_s26, %s2662_s7  ;;  %p3412_p1 = scmp.ne.s32.totalorder %s3404_s15, 0 }
  0xc2   : > { %s2790_s8 = smov [#allocation11]  }
  0xc3   : > { %2185 = vmatmul.mubr.msk.bf16.vlgmr.msra.gmra.mrb[0].mxu1 %vm379_vm1, %v3087_v5  ;;  %p2664_p2 = pnand %p2663_p12, %p3412_p1 }
  0xc4   : > { %2189 = vmatpush3.bf16.msra.mxu1 %v2480_v4  ;;  %2192 = vmatprep.mubr.msk.bf16.mxu1 %vm2782_vm0, %v2781_v0 }
  0xc5   : > { %2190 = vmatprep.subr.bf16.mxu1 %v2781_v0  ;;  %p2665_p4 = pneg %p2664_p2 }
  0xc8   : > { %2191 = vmatpush3.bf16.msra.mxu1 %v2481_v6  ;;  %v759_v6 = vsel %vm549_vm3, %v594_v1, 0 }
  0xc9   : > { %2202 = vmatprep.subr.bf16.mxu1 %v2781_v0 }
  0xcb   : > { %2193 = vmatmul.mubr.msk.bf16.vlgmr.msra.gmra.mrb[4].mxu1 %vm379_vm1, %v3097_v8 }
  0xcc   : > { %2204 = vmatprep.mubr.msk.bf16.mxu1 %vm2782_vm0, %v2781_v0 }
 0x196   : > { %v417_v9 = vpop.f32.mrb[0].mxu1 }
 0x197   : > { %v2186_v10 = vpop.f32.mrb[1].mxu1  ;;  %v3110_v19 = vpack.c.bf16 %v417_v9, %v417_v9 }
 0x198   : > { %v420_v11 = vpop.f32.mrb[2].mxu1 }
 0x199   : > { %v2187_v12 = vpop.f32.mrb[3].mxu1 }
 0x19e   : > { %v476_v13 = vpop.f32.mrb[4].mxu1 }
 0x19f   : > { %v3104_v14 = vpack.c.bf16 %v476_v13, %v476_v13  ;;  %v2194_v15 = vpop.f32.mrb[5].mxu1 }
 0x1a0   : > { %v479_v16 = vpop.f32.mrb[6].mxu1 }
 0x1a1   : > { %598 = vrot.lane.b32.xlu0 %v3104_v14, %s2783_s27  ;;  %v2195_v17 = vpop.f32.mrb[7].mxu1  ;;  %v489_v18 = vsel %vm484_vm2, %v3104_v14, 0 }
 0x1a2   : > { %2197 = vmatpush3.bf16.xpose.msra.mxu0 %v489_v18 }
 0x1a3   : > { %2208 = vmatprep.subr.bf16.mxu0 %v2781_v0 }
 0x1a5   : > { %596 = vrot.lane.b32.xlu0 %v3110_v19, %s2783_s27 }
 0x1a9   : > { %2199 = vmatmul.mubr.msk.bf16.vlgmr.msra.gmra.mrb[0].mxu0 %vm484_vm2, %v3110_v19 }
 0x1aa   : > { %2210 = vmatprep.mubr.msk.bf16.mxu0 %vm2782_vm0, %v2781_v0 }
 0x213   : > { %v599_v20 = vpop.permute.xlu0 %598 }
 0x214   : > { %v604_v21 = vsel %vm484_vm2, %v599_v20, 0 }
 0x215   : > { %2209 = vmatpush3.bf16.xpose.msra.mxu0 %v604_v21 }
 0x216   : > { %2220 = vmatprep.subr.bf16.mxu0 %v2781_v0 }
 0x217   : > { %v597_v22 = vpop.permute.xlu0 %596 }
 0x21c   : > { %2211 = vmatmul.mubr.msk.bf16.vlgmr.msra.gmra.mrb[4].mxu0 %vm484_vm2, %v597_v22 }
 0x21d   : > { %2222 = vmatprep.mubr.msk.bf16.mxu0 %vm2782_vm0, %v2781_v0  ;;  %2221 = vmatpush3.bf16.msra.mxu0 %v713_v59 }
 0x21e   : > { %2226 = vmatprep.subr.bf16.mxu0 %v2781_v0 }
 0x27c   : > { %v525_v23 = vpop.f32.mrb[0].mxu0 }
 0x27d   : > { %v2200_v24 = vpop.f32.mrb[1].mxu0  ;;  %v531_v25 = vsel %vm484_vm2, %v525_v23, -inf }
 0x27e   : > { %532 = vmax.xlane.f32.xlu1 %v531_v25  ;;  %v528_v26 = vpop.f32.mrb[2].mxu0 }
 0x27f   : > { %v2201_v27 = vpop.f32.mrb[3].mxu0 }
 0x2ef   : > { %v640_v28 = vpop.f32.mrb[4].mxu0 }
 0x2f0   : > { %v2212_v29 = vpop.f32.mrb[5].mxu0  ;;  %v646_v30 = vsel %vm484_vm2, %v640_v28, -inf }
 0x2f1   : > { %647 = vmax.xlane.f32.xlu1 %v646_v30  ;;  %v643_v31 = vpop.f32.mrb[6].mxu0 }
 0x2f2   : > { %v2213_v32 = vpop.f32.mrb[7].mxu0  ;;  %v913_v31 = vld [vmem:[#allocation10 + $0x8] sm:$0xf] }
 0x2f3   : > { %v918_v32 = vsel %vm549_vm3, %v913_v31, 0 }
 0x302   : > { %544 = vrot.lane.b32.xlu1 %v3104_v14, %s2784_s11 }
 0x306   : > { %658 = vrot.lane.b32.xlu1 %v3104_v14, %s2785_s30 }
 0x30b   : > { %v533_v33 = vpop.xlane.xlu1 %532 }
 0x30c   : > { %v534_v34 = vsub.f32 %v525_v23, %v533_v33 }
 0x30e   : > { %v535_v35 = vmul.f32 1.442695, %v534_v34 }
 0x310   : > { %2486 = vpow2.f32 %v535_v35 }
 0x31a   : > { %v2487_v36 = vpop.eup %2486 }
 0x31b   : > { %v537_v37 = vsel %vm484_vm2, %v2487_v36, 0.0 }
 0x31c   : > { %538 = vadd.xlane.f32.xlu0 %v537_v37 }
 0x37e   : > { %v648_v38 = vpop.xlane.xlu1 %647 }
 0x37f   : > { %v649_v39 = vsub.f32 %v640_v28, %v648_v38 }
 0x381   : > { %v650_v40 = vmul.f32 1.442695, %v649_v39 }
 0x382   : > { %v545_v41 = vpop.permute.xlu1 %544 }
 0x383   : > { %2488 = vpow2.f32 %v650_v40  ;;  %v551_v42 = vsel %vm549_vm3, %v545_v41, 0 }
 0x384   : > { %2203 = vmatpush3.bf16.msra.mxu1 %v551_v42 }
 0x385   : > { %2214 = vmatprep.subr.bf16.mxu1 %v2781_v0 }
 0x386   : > { %v659_v48 = vpop.permute.xlu1 %658 }
 0x387   : > { %v664_v50 = vsel %vm549_vm3, %v659_v48, 0 }
 0x38d   : > { %v2489_v43 = vpop.eup %2488 }
 0x38e   : > { %v652_v44 = vsel %vm484_vm2, %v2489_v43, 0.0 }
 0x38f   : > { %653 = vadd.xlane.f32.xlu1 %v652_v44  ;;  %v2483_v44 = vld [vmem:[#allocation7 + $0x18] sm:$0xff]  }
 0x3a0   : > { %803 = vrot.lane.b32.xlu1 %v3104_v14, %s2786_s16 }
 0x3a4   : > { %801 = vrot.lane.b32.xlu1 %v3110_v19, %s2786_s16 }
 0x3a9   : > { %v539_v45 = vpop.xlane.xlu0 %538 }
 0x3aa   : > { %2490 = vrcp.f32 %v539_v45  ;;  %v2484_v45 = vld [vmem:[#allocation8 + $0x10] sm:$0xff]  }
 0x3b4   : > { %v2491_v46 = vpop.eup %2490 }
 0x3b5   : > { %v541_v47 = vmul.f32 %v2491_v46, %v2487_v36  ;;  %v2485_v46 = vld [vmem:[#allocation8 + $0x18] sm:$0xff]  }
 0x3b7   : > { %v542_v49 = vpack.c.bf16 %v541_v47, %v541_v47 }
 0x3b9   : > { %2205 = vmatmul.mubr.msk.bf16.vlgmr.msra.gmra.mrb[8].mxu1 %vm484_vm2, %v542_v49 }
 0x3ba   : > { %2215 = vmatpush3.bf16.msra.mxu1 %v664_v50  ;;  %2216 = vmatprep.mubr.msk.bf16.mxu1 %vm2782_vm0, %v2781_v0 }
 0x3bb   : > { %2232 = vmatprep.subr.bf16.mxu1 %v2781_v0 }
 0x41c   : > { %v654_v51 = vpop.xlane.xlu1 %653 }
 0x41d   : > { %2492 = vrcp.f32 %v654_v51 }
 0x420   : > { %v804_v54 = vpop.permute.xlu1 %803 }
 0x421   : > { %v809_v56 = vsel %vm484_vm2, %v804_v54, 0 }
 0x424   : > { %v802_v57 = vpop.permute.xlu1 %801 }
 0x427   : > { %v2493_v52 = vpop.eup %2492 }
 0x428   : > { %v656_v53 = vmul.f32 %v2493_v52, %v2489_v43  ;;  %v2482_v43 = vld [vmem:[#allocation7 + $0x10] sm:$0xff]  }
 0x42a   : > { %v657_v55 = vpack.c.bf16 %v656_v53, %v656_v53 }
 0x42c   : > { %2217 = vmatmul.mubr.msk.bf16.vlgmr.msra.gmra.mrb[12].mxu1 %vm484_vm2, %v657_v55 }
 0x42d   : > { %2233 = vmatpush3.bf16.xpose.msra.mxu1 %v809_v56  ;;  %2234 = vmatprep.mubr.msk.bf16.mxu1 %vm2782_vm0, %v2781_v0 }
 0x42e   : > { %2238 = vmatprep.subr.bf16.mxu1 %v2781_v0 }
 0x434   : > { %2235 = vmatmul.mubr.msk.bf16.vlgmr.msra.gmra.mrb[16].mxu1 %vm484_vm2, %v802_v57 }
 0x435   : > { %2240 = vmatprep.mubr.msk.bf16.mxu1 %vm2782_vm0, %v2781_v0 }
 0x48c   : > { %v587_v60 = vpop.f32.mrb[8].mxu1 }
 0x48d   : > { %v2206_v61 = vpop.f32.mrb[9].mxu1  ;;  %v593_v16 = vpack.c.bf16 %v587_v60, %v587_v60 }
 0x48e   : > { %v590_v62 = vpop.f32.mrb[10].mxu1 }
 0x48f   : > { %v2207_v63 = vpop.f32.mrb[11].mxu1 }
 0x490   : > { %v1073_v63 = vld [vmem:[#allocation10 + $0xc] sm:$0xf] }
 0x4ff   : > { %v700_v2 = vpop.f32.mrb[12].mxu1 }
 0x500   : > { %v706_v3 = vpack.c.bf16 %v700_v2, %v700_v2  ;;  %v2218_v4 = vpop.f32.mrb[13].mxu1 }
 0x501   : > { %v703_v7 = vpop.f32.mrb[14].mxu1 }
 0x502   : > { %v2219_v9 = vpop.f32.mrb[15].mxu1  ;;  %2223 = vmatmul.mubr.msk.bf16.vlgmr.msra.gmra.mrb[8].mxu0 %vm484_vm2, %v706_v3  ;;  %v1078_v3 = vsel %vm549_vm3, %v1073_v63, 0 }
 0x503   : > { %2227 = vmatpush3.bf16.msra.mxu0 %v759_v6  ;;  %2228 = vmatprep.mubr.msk.bf16.mxu0 %vm2782_vm0, %v2781_v0 }
 0x504   : > { %2244 = vmatprep.subr.bf16.mxu0 %v2781_v0 }
 0x507   : > { %v845_v10 = vpop.f32.mrb[16].mxu1 }
 0x508   : > { %v2236_v11 = vpop.f32.mrb[17].mxu1  ;;  %v851_v12 = vsel %vm484_vm2, %v845_v10, -inf }
 0x509   : > { %852 = vmax.xlane.f32.xlu0 %v851_v12  ;;  %v848_v13 = vpop.f32.mrb[18].mxu1 }
 0x50a   : > { %v2237_v15 = vpop.f32.mrb[19].mxu1 }
 0x50e   : > { %2229 = vmatmul.mubr.msk.bf16.vlgmr.msra.gmra.mrb[8].mxu0 %vm484_vm2, %v593_v16 }
 0x50f   : > { %2246 = vmatprep.mubr.msk.bf16.mxu0 %vm2782_vm0, %v2781_v0  ;;  %2245 = vmatpush3.bf16.msra.mxu0 %v918_v32 }
 0x510   : > { %2256 = vmatprep.subr.bf16.mxu0 %v2781_v0 }
 0x51f   : > { %863 = vrot.lane.b32.xlu0 %v3104_v14, %s2787_s17 }
 0x523   : > { %963 = vrot.lane.b32.xlu0 %v3104_v14, %s2788_s10 }
 0x527   : > { %961 = vrot.lane.b32.xlu0 %v3110_v19, %s2788_s10 }
 0x596   : > { %v853_v17 = vpop.xlane.xlu0 %852 }
 0x597   : > { %v854_v18 = vsub.f32 %v845_v10, %v853_v17 }
 0x599   : > { %v855_v20 = vmul.f32 1.442695, %v854_v18 }
 0x59a   : > { %v864_v21 = vpop.permute.xlu0 %863 }
 0x59b   : > { %2494 = vpow2.f32 %v855_v20  ;;  %v869_v22 = vsel %vm549_vm3, %v864_v21, 0 }
 0x59c   : > { %2239 = vmatpush3.bf16.msra.mxu1 %v869_v22 }
 0x59d   : > { %2250 = vmatprep.subr.bf16.mxu1 %v2781_v0 }
 0x59e   : > { %v964_v28 = vpop.permute.xlu0 %963 }
 0x59f   : > { %v969_v29 = vsel %vm484_vm2, %v964_v28, 0 }
 0x5a2   : > { %v962_v30 = vpop.permute.xlu0 %961 }
 0x5a5   : > { %v2495_v23 = vpop.eup %2494 }
 0x5a6   : > { %v857_v24 = vsel %vm484_vm2, %v2495_v23, 0.0 }
 0x5a7   : > { %858 = vadd.xlane.f32.xlu1 %v857_v24 }
 0x634   : > { %v859_v25 = vpop.xlane.xlu1 %858 }
 0x635   : > { %2496 = vrcp.f32 %v859_v25 }
 0x63f   : > { %v2497_v26 = vpop.eup %2496 }
 0x640   : > { %v861_v27 = vmul.f32 %v2497_v26, %v2495_v23 }
 0x642   : > { %v862_v19 = vpack.c.bf16 %v861_v27, %v861_v27 }
 0x644   : > { %2241 = vmatmul.mubr.msk.bf16.vlgmr.msra.gmra.mrb[20].mxu1 %vm484_vm2, %v862_v19 }
 0x645   : > { %2251 = vmatpush3.bf16.xpose.msra.mxu1 %v969_v29  ;;  %2252 = vmatprep.mubr.msk.bf16.mxu1 %vm2782_vm0, %v2781_v0 }
 0x646   : > { %2268 = vmatprep.subr.bf16.mxu1 %v2781_v0 }
 0x64c   : > { %2253 = vmatmul.mubr.msk.bf16.vlgmr.msra.gmra.mrb[24].mxu1 %vm484_vm2, %v962_v30 }
 0x64d   : > { %2272 = vmatprep.mubr.msk.bf16.mxu1 %vm2782_vm0, %v2781_v0  ;;  %2269 = vmatpush3.bf16.msra.mxu1 %v2482_v43 }
 0x64e   : > { %2270 = vmatprep.subr.bf16.mxu1 %v2781_v0 }
 0x651   : > { %2271 = vmatpush3.bf16.msra.mxu1 %v2483_v44 }
 0x652   : > { %2276 = vmatprep.subr.bf16.mxu1 %v2781_v0 }
 0x654   : > { %2273 = vmatmul.mubr.msk.bf16.vlgmr.msra.gmra.mrb[28].mxu1 %vm379_vm1, %v3097_v8 }
 0x655   : > { %2277 = vmatpush3.bf16.msra.mxu1 %v2484_v45  ;;  %2280 = vmatprep.mubr.msk.bf16.mxu1 %vm2782_vm0, %v2781_v0 }
 0x656   : > { %2278 = vmatprep.subr.bf16.mxu1 %v2781_v0 }
 0x659   : > { %2279 = vmatpush3.bf16.msra.mxu1 %v2485_v46 }
 0x65a   : > { %2290 = vmatprep.subr.bf16.mxu1 %v2781_v0 }
 0x65c   : > { %2281 = vmatmul.mubr.msk.bf16.vlgmr.msra.gmra.mrb[32].mxu1 %vm379_vm1, %v3087_v5 }
 0x65d   : > { %2292 = vmatprep.mubr.msk.bf16.mxu1 %vm2782_vm0, %v2781_v0 }
 0x717   : > { %v905_v33 = vpop.f32.mrb[20].mxu1 }
 0x718   : > { %v911_v34 = vpack.c.bf16 %v905_v33, %v905_v33  ;;  %v2242_v35 = vpop.f32.mrb[21].mxu1 }
 0x719   : > { %v908_v36 = vpop.f32.mrb[22].mxu1 }
 0x71a   : > { %v2243_v37 = vpop.f32.mrb[23].mxu1  ;;  %2247 = vmatmul.mubr.msk.bf16.vlgmr.msra.gmra.mrb[8].mxu0 %vm484_vm2, %v911_v34 }
 0x71b   : > { %2258 = vmatprep.mubr.msk.bf16.mxu0 %vm2782_vm0, %v2781_v0 }
 0x71f   : > { %v1005_v38 = vpop.f32.mrb[24].mxu1 }
 0x720   : > { %v2254_v39 = vpop.f32.mrb[25].mxu1  ;;  %v1011_v40 = vsel %vm484_vm2, %v1005_v38, -inf }
 0x721   : > { %1012 = vmax.xlane.f32.xlu0 %v1011_v40  ;;  %v1008_v41 = vpop.f32.mrb[26].mxu1 }
 0x722   : > { %v2255_v42 = vpop.f32.mrb[27].mxu1 }
 0x727   : > { %v1173_v51 = vpop.f32.mrb[28].mxu1 }
 0x728   : > { %v2274_v52 = vpop.f32.mrb[29].mxu1  ;;  %v3202_v58 = vpack.c.bf16 %v1173_v51, %v1173_v51 }
 0x729   : > { %v1176_v53 = vpop.f32.mrb[30].mxu1 }
 0x72a   : > { %v2275_v54 = vpop.f32.mrb[31].mxu1 }
 0x72b   : > { %v1461_v54 = vld [vmem:[#allocation10 + $0x14] sm:$0xf] }
 0x72f   : > { %v1230_v5 = vpop.f32.mrb[32].mxu1 }
 0x730   : > { %v3200_v55 = vpack.c.bf16 %v1230_v5, %v1230_v5  ;;  %v2282_v56 = vpop.f32.mrb[33].mxu1  ;;  %v1466_v5 = vsel %vm549_vm3, %v1461_v54, 0 }
 0x731   : > { %v1233_v57 = vpop.f32.mrb[34].mxu1 }
 0x732   : > { %v2283_v59 = vpop.f32.mrb[35].mxu1  ;;  %v1242_v11 = vsel %vm484_vm2, %v3200_v55, 0 }
 0x7ae   : > { %v1013_v47 = vpop.xlane.xlu0 %1012 }
 0x7af   : > { %v1014_v48 = vsub.f32 %v1005_v38, %v1013_v47 }
 0x7b1   : > { %v1015_v49 = vmul.f32 1.442695, %v1014_v48 }
 0x7b3   : > { %2498 = vpow2.f32 %v1015_v49 }
 0x7bd   : > { %v2499_v8 = vpop.eup %2498 }
 0x7be   : > { %v1017_v50 = vsel %vm484_vm2, %v2499_v8, 0.0 }
 0x7bf   : > { %1018 = vadd.xlane.f32.xlu1 %v1017_v50 }
 0x7d0   : > { %1023 = vrot.lane.b32.xlu1 %v3104_v14, %s2789_s3 }
 0x7d4   : > { %1351 = vrot.lane.b32.xlu1 %v3200_v55, %s2783_s27 }
 0x7d8   : > { %1349 = vrot.lane.b32.xlu1 %v3202_v58, %s2783_s27  ;;  %s2666_s27 = sshll.u32 %s2790_s8, 4  ;;  %s2667_s27 = int_to_ptr.vmem [resolvable:$false] %s2666_s27 }
 0x7d9   : > { %p2669_p0 = scmp.lt.s32.totalorder %s1895_s26, %s2667_s27 }
 0x84c   : > { %v1019_v60 = vpop.xlane.xlu1 %1018 }
 0x84d   : > { %2500 = vrcp.f32 %v1019_v60 }
 0x850   : > { %v1024_v14 = vpop.permute.xlu1 %1023 }
 0x851   : > { %v1029_v61 = vsel %vm549_vm3, %v1024_v14, 0  ;;  %v1347_v14 = vld [vmem:[#allocation10 + $0x10] sm:$0xf] }
 0x852   : > { %2257 = vmatpush3.bf16.msra.mxu0 %v1029_v61 }
 0x853   : > { %2262 = vmatprep.subr.bf16.mxu0 %v2781_v0 }
 0x854   : > { %v1352_v12 = vpop.permute.xlu1 %1351 }
 0x855   : > { %v1357_v13 = vsel %vm484_vm2, %v1352_v12, 0 }
 0x857   : > { %v2501_v62 = vpop.eup %2500 }
 0x858   : > { %v1021_v1 = vmul.f32 %v2501_v62, %v2499_v8  ;;  %v1350_v15 = vpop.permute.xlu1 %1349 }
 0x85a   : > { %v1022_v2 = vpack.c.bf16 %v1021_v1, %v1021_v1  ;;  %v1512_v1 = vsel %vm549_vm3, %v1347_v14, 0 }
 0x85c   : > { %2259 = vmatmul.mubr.msk.bf16.vlgmr.msra.gmra.mrb[12].mxu0 %vm484_vm2, %v1022_v2 }
 0x85d   : > { %2263 = vmatpush3.bf16.msra.mxu0 %v1078_v3  ;;  %2264 = vmatprep.mubr.msk.bf16.mxu0 %vm2782_vm0, %v2781_v0 }
 0x85e   : > { %2284 = vmatprep.subr.bf16.mxu0 %v2781_v0 }
 0x92f   : > { %v1065_v4 = vpop.f32.mrb[12].mxu0 }
 0x930   : > { %v1071_v6 = vpack.c.bf16 %v1065_v4, %v1065_v4  ;;  %v2260_v7 = vpop.f32.mrb[13].mxu0 }
 0x931   : > { %v1068_v9 = vpop.f32.mrb[14].mxu0 }
 0x932   : > { %v2261_v10 = vpop.f32.mrb[15].mxu0  ;;  %2265 = vmatmul.mubr.msk.bf16.vlgmr.msra.gmra.mrb[8].mxu0 %vm484_vm2, %v1071_v6 }
 0x933   : > { %2285 = vmatpush3.bf16.xpose.msra.mxu0 %v1242_v11  ;;  %2286 = vmatprep.mubr.msk.bf16.mxu0 %vm2782_vm0, %v2781_v0 }
 0x934   : > { %2296 = vmatprep.subr.bf16.mxu0 %v2781_v0 }
 0x93a   : > { %2287 = vmatmul.mubr.msk.bf16.vlgmr.msra.gmra.mrb[16].mxu0 %vm484_vm2, %v3202_v58 }
 0x93b   : > { %2297 = vmatpush3.bf16.xpose.msra.mxu0 %v1357_v13  ;;  %2298 = vmatprep.mubr.msk.bf16.mxu0 %vm2782_vm0, %v2781_v0 }
 0x93c   : > { %2308 = vmatprep.subr.bf16.mxu0 %v2781_v0 }
 0x942   : > { %2299 = vmatmul.mubr.msk.bf16.vlgmr.msra.gmra.mrb[20].mxu0 %vm484_vm2, %v1350_v15 }
 0x943   : > { %2310 = vmatprep.mubr.msk.bf16.mxu0 %vm2782_vm0, %v2781_v0  ;;  %2309 = vmatpush3.bf16.msra.mxu0 %v1466_v5 }
 0x944   : > { %2314 = vmatprep.subr.bf16.mxu0 %v2781_v0 }
 0xa05   : > { %v1114_v16 = vpop.f32.mrb[8].mxu0 }
 0xa06   : > { %1121 = vst.msk [vmem:[%s350_s12] sm:$0xff] %vm379_vm1, %v1114_v16  ;;  %v2266_v17 = vpop.f32.mrb[9].mxu0 }
 0xa07   : > { %v1117_v18 = vpop.f32.mrb[10].mxu0 }
 0xa08   : > { %v2267_v20 = vpop.f32.mrb[11].mxu0 }
 0xa0d   : > { %v1278_v21 = vpop.f32.mrb[16].mxu0 }
 0xa0e   : > { %v2288_v22 = vpop.f32.mrb[17].mxu0  ;;  %v1284_v23 = vsel %vm484_vm2, %v1278_v21, -inf }
 0xa0f   : > { %1285 = vmax.xlane.f32.xlu0 %v1284_v23  ;;  %v1281_v24 = vpop.f32.mrb[18].mxu0 }
 0xa10   : > { %v2289_v25 = vpop.f32.mrb[19].mxu0 }
 0xa15   : > { %v1393_v26 = vpop.f32.mrb[20].mxu0 }
 0xa16   : > { %v1399_v27 = vsel %vm484_vm2, %v1393_v26, -inf  ;;  %v2300_v28 = vpop.f32.mrb[21].mxu0 }
 0xa17   : > { %1400 = vmax.xlane.f32.xlu1 %v1399_v27  ;;  %v1396_v19 = vpop.f32.mrb[22].mxu0  ;;  %v1666_v27 = vld [vmem:[#allocation10 + $0x18] sm:$0xf] }
 0xa18   : > { %v2301_v29 = vpop.f32.mrb[23].mxu0  ;;  %v1671_v28 = vsel %vm549_vm3, %v1666_v27, 0 }
 0xa25   : > { %1297 = vrot.lane.b32.xlu0 %v3200_v55, %s2784_s11  ;;  %s2668_s11 = scalar_lea.vmem %s2667_s27, 256 }
 0xa26   : > { %p2670_p8 = scmp.lt.s32.totalorder %s2668_s11, %s2662_s7 }
 0xa28   : > { %1554 = vrot.lane.b32.xlu1 %v3202_v58, %s2786_s16  ;;  %p2671_p6 = por %p2670_p8, %p2669_p0 }
 0xa2a   : > { %p2672_p10 = pnand %p2671_p6, %p2665_p4 }
 0xa9c   : > { %v1286_v30 = vpop.xlane.xlu0 %1285 }
 0xa9d   : > { %v1287_v31 = vsub.f32 %v1278_v21, %v1286_v30 }
 0xa9f   : > { %v1288_v32 = vmul.f32 1.442695, %v1287_v31 }
 0xaa0   : > { %v1298_v33 = vpop.permute.xlu0 %1297 }
 0xaa1   : > { %2502 = vpow2.f32 %v1288_v32  ;;  %v1303_v34 = vsel %vm549_vm3, %v1298_v33, 0 }
 0xaa2   : > { %2291 = vmatpush3.bf16.msra.mxu1 %v1303_v34 }
 0xaa3   : > { %2302 = vmatprep.subr.bf16.mxu1 %v2781_v0 }
 0xaa4   : > { %v1401_v37 = vpop.xlane.xlu1 %1400 }
 0xaa5   : > { %v1402_v38 = vsub.f32 %v1393_v26, %v1401_v37 }
 0xaa7   : > { %v1403_v39 = vmul.f32 1.442695, %v1402_v38 }
 0xaa8   : > { %v1555_v53 = vpop.permute.xlu1 %1554 }
 0xaa9   : > { %2504 = vpow2.f32 %v1403_v39 }
 0xaab   : > { %v2503_v35 = vpop.eup %2502 }
 0xaac   : > { %v1290_v36 = vsel %vm484_vm2, %v2503_v35, 0.0 }
 0xaad   : > { %1291 = vadd.xlane.f32.xlu0 %v1290_v36 }
 0xab3   : > { %v2505_v40 = vpop.eup %2504 }
 0xab4   : > { %v1405_v41 = vsel %vm484_vm2, %v2505_v40, 0.0 }
 0xac3   : > { %1411 = vrot.lane.b32.xlu0 %v3200_v55, %s2785_s30 }
 0xae2   : > { %1406 = vadd.xlane.f32.xlu0 %v1405_v41 }
 0xaf8   : > { %1556 = vrot.lane.b32.xlu0 %v3200_v55, %s2786_s16 }
 0xb3a   : > { %v1292_v42 = vpop.xlane.xlu0 %1291 }
 0xb3b   : > { %2506 = vrcp.f32 %v1292_v42 }
 0xb3e   : > { %v1412_v45 = vpop.permute.xlu0 %1411 }
 0xb3f   : > { %v1417_v47 = vsel %vm549_vm3, %v1412_v45, 0 }
 0xb45   : > { %v2507_v43 = vpop.eup %2506 }
 0xb46   : > { %v1294_v44 = vmul.f32 %v2507_v43, %v2503_v35 }
 0xb48   : > { %v1295_v46 = vpack.c.bf16 %v1294_v44, %v1294_v44 }
 0xb4a   : > { %2293 = vmatmul.mubr.msk.bf16.vlgmr.msra.gmra.mrb[36].mxu1 %vm484_vm2, %v1295_v46 }
 0xb4b   : > { %2303 = vmatpush3.bf16.msra.mxu1 %v1417_v47  ;;  %2304 = vmatprep.mubr.msk.bf16.mxu1 %vm2782_vm0, %v2781_v0 }
 0xb4c   : > { %2320 = vmatprep.subr.bf16.mxu1 %v2781_v0 }
 0xb6f   : > { %v1407_v48 = vpop.xlane.xlu0 %1406 }
 0xb70   : > { %2508 = vrcp.f32 %v1407_v48 }
 0xb73   : > { %v1557_v50 = vpop.permute.xlu0 %1556 }
 0xb74   : > { %v1562_v52 = vsel %vm484_vm2, %v1557_v50, 0 }
 0xb7a   : > { %v2509_v49 = vpop.eup %2508 }
 0xb7b   : > { %v1409_v8 = vmul.f32 %v2509_v49, %v2505_v40 }
 0xb7d   : > { %v1410_v51 = vpack.c.bf16 %v1409_v8, %v1409_v8 }
 0xb7f   : > { %2305 = vmatmul.mubr.msk.bf16.vlgmr.msra.gmra.mrb[40].mxu1 %vm484_vm2, %v1410_v51 }
 0xb80   : > { %2321 = vmatpush3.bf16.xpose.msra.mxu1 %v1562_v52  ;;  %2322 = vmatprep.mubr.msk.bf16.mxu1 %vm2782_vm0, %v2781_v0 }
 0xb81   : > { %2326 = vmatprep.subr.bf16.mxu1 %v2781_v0 }
 0xb87   : > { %2323 = vmatmul.mubr.msk.bf16.vlgmr.msra.gmra.mrb[44].mxu1 %vm484_vm2, %v1555_v53 }
 0xb88   : > { %2328 = vmatprep.mubr.msk.bf16.mxu1 %vm2782_vm0, %v2781_v0 }
 0xc1d   : > { %v1339_v56 = vpop.f32.mrb[36].mxu1 }
 0xc1e   : > { %v2294_v57 = vpop.f32.mrb[37].mxu1  ;;  %v1345_v11 = vpack.c.bf16 %v1339_v56, %v1339_v56 }
 0xc1f   : > { %v1342_v59 = vpop.f32.mrb[38].mxu1 }
 0xc20   : > { %v2295_v60 = vpop.f32.mrb[39].mxu1 }
 0xc52   : > { %v1453_v61 = vpop.f32.mrb[40].mxu1 }
 0xc53   : > { %v1459_v62 = vpack.c.bf16 %v1453_v61, %v1453_v61  ;;  %v2306_v63 = vpop.f32.mrb[41].mxu1 }
 0xc54   : > { %v1456_v2 = vpop.f32.mrb[42].mxu1 }
 0xc55   : > { %v2307_v3 = vpop.f32.mrb[43].mxu1  ;;  %2311 = vmatmul.mubr.msk.bf16.vlgmr.msra.gmra.mrb[24].mxu0 %vm484_vm2, %v1459_v62 }
 0xc56   : > { %2315 = vmatpush3.bf16.msra.mxu0 %v1512_v1  ;;  %2316 = vmatprep.mubr.msk.bf16.mxu0 %vm2782_vm0, %v2781_v0 }
 0xc57   : > { %2332 = vmatprep.subr.bf16.mxu0 %v2781_v0 }
 0xc5a   : > { %v1598_v4 = vpop.f32.mrb[44].mxu1 }
 0xc5b   : > { %v2324_v6 = vpop.f32.mrb[45].mxu1  ;;  %v1604_v7 = vsel %vm484_vm2, %v1598_v4, -inf }
 0xc5c   : > { %1605 = vmax.xlane.f32.xlu0 %v1604_v7  ;;  %v1601_v9 = vpop.f32.mrb[46].mxu1 }
 0xc5d   : > { %v2325_v10 = vpop.f32.mrb[47].mxu1 }
 0xc61   : > { %2317 = vmatmul.mubr.msk.bf16.vlgmr.msra.gmra.mrb[24].mxu0 %vm484_vm2, %v1345_v11 }
 0xc62   : > { %2334 = vmatprep.mubr.msk.bf16.mxu0 %vm2782_vm0, %v2781_v0  ;;  %2333 = vmatpush3.bf16.msra.mxu0 %v1671_v28 }
 0xc63   : > { %2344 = vmatprep.subr.bf16.mxu0 %v2781_v0 }
 0xc72   : > { %1616 = vrot.lane.b32.xlu0 %v3200_v55, %s2787_s17 }
 0xc76   : > { %1714 = vrot.lane.b32.xlu0 %v3202_v58, %s2788_s10 }
 0xce9   : > { %v1606_v12 = vpop.xlane.xlu0 %1605 }
 0xcea   : > { %v1607_v13 = vsub.f32 %v1598_v4, %v1606_v12 }
 0xcec   : > { %v1608_v15 = vmul.f32 1.442695, %v1607_v13 }
 0xced   : > { %v1617_v16 = vpop.permute.xlu0 %1616 }
 0xcee   : > { %2510 = vpow2.f32 %v1608_v15  ;;  %v1622_v17 = vsel %vm549_vm3, %v1617_v16, 0 }
 0xcef   : > { %2327 = vmatpush3.bf16.msra.mxu1 %v1622_v17 }
 0xcf0   : > { %2338 = vmatprep.subr.bf16.mxu1 %v2781_v0 }
 0xcf1   : > { %v1715_v26 = vpop.permute.xlu0 %1714 }
 0xcf8   : > { %v2511_v18 = vpop.eup %2510 }
 0xcf9   : > { %v1610_v20 = vsel %vm484_vm2, %v2511_v18, 0.0 }
 0xcfa   : > { %1611 = vadd.xlane.f32.xlu1 %v1610_v20 }
 0xd0b   : > { %1716 = vrot.lane.b32.xlu1 %v3200_v55, %s2788_s10 }
 0xd87   : > { %v1612_v21 = vpop.xlane.xlu1 %1611 }
 0xd88   : > { %2512 = vrcp.f32 %v1612_v21 }
 0xd8b   : > { %v1717_v23 = vpop.permute.xlu1 %1716 }
 0xd8c   : > { %v1722_v25 = vsel %vm484_vm2, %v1717_v23, 0 }
 0xd92   : > { %v2513_v58 = vpop.eup %2512 }
 0xd93   : > { %v1614_v22 = vmul.f32 %v2513_v58, %v2511_v18 }
 0xd95   : > { %v1615_v24 = vpack.c.bf16 %v1614_v22, %v1614_v22 }
 0xd97   : > { %2329 = vmatmul.mubr.msk.bf16.vlgmr.msra.gmra.mrb[48].mxu1 %vm484_vm2, %v1615_v24 }
 0xd98   : > { %2339 = vmatpush3.bf16.xpose.msra.mxu1 %v1722_v25  ;;  %2340 = vmatprep.mubr.msk.bf16.mxu1 %vm2782_vm0, %v2781_v0 }
 0xd9f   : > { %2341 = vmatmul.mubr.msk.bf16.vlgmr.msra.gmra.mrb[52].mxu1 %vm484_vm2, %v1715_v26 }
 0xe6a   : > { %v1658_v19 = vpop.f32.mrb[48].mxu1 }
 0xe6b   : > { %v1664_v29 = vpack.c.bf16 %v1658_v19, %v1658_v19  ;;  %v2330_v30 = vpop.f32.mrb[49].mxu1 }
 0xe6c   : > { %v1661_v31 = vpop.f32.mrb[50].mxu1 }
 0xe6d   : > { %v2331_v32 = vpop.f32.mrb[51].mxu1  ;;  %2335 = vmatmul.mubr.msk.bf16.vlgmr.msra.gmra.mrb[24].mxu0 %vm484_vm2, %v1664_v29 }
 0xe6e   : > { %2346 = vmatprep.mubr.msk.bf16.mxu0 %vm2782_vm0, %v2781_v0 }
 0xe72   : > { %v1758_v33 = vpop.f32.mrb[52].mxu1 }
 0xe73   : > { %v2342_v34 = vpop.f32.mrb[53].mxu1  ;;  %v1764_v35 = vsel %vm484_vm2, %v1758_v33, -inf }
 0xe74   : > { %1765 = vmax.xlane.f32.xlu0 %v1764_v35  ;;  %v1761_v36 = vpop.f32.mrb[54].mxu1 }
 0xe75   : > { %v2343_v37 = vpop.f32.mrb[55].mxu1 }
 0xe8a   : > { %1776 = vrot.lane.b32.xlu0 %v3200_v55, %s2789_s3  ;;  %v1826_v55 = vld [vmem:[#allocation10 + $0x1c] sm:$0xf] }
 0xe8b   : > { %v1831_v49 = vsel %vm549_vm3, %v1826_v55, 0 }
 0xf01   : > { %v1766_v38 = vpop.xlane.xlu0 %1765 }
 0xf02   : > { %v1767_v39 = vsub.f32 %v1758_v33, %v1766_v38 }
 0xf04   : > { %v1768_v40 = vmul.f32 1.442695, %v1767_v39 }
 0xf05   : > { %v1777_v41 = vpop.permute.xlu0 %1776 }
 0xf06   : > { %2514 = vpow2.f32 %v1768_v40  ;;  %v1782_v42 = vsel %vm549_vm3, %v1777_v41, 0 }
 0xf07   : > { %2345 = vmatpush3.bf16.msra.mxu0 %v1782_v42 }
 0xf08   : > { %2350 = vmatprep.subr.bf16.mxu0 %v2781_v0 }
 0xf10   : > { %v2515_v43 = vpop.eup %2514 }
 0xf11   : > { %v1770_v44 = vsel %vm484_vm2, %v2515_v43, 0.0 }
 0xf12   : > { %1771 = vadd.xlane.f32.xlu1 %v1770_v44 }
 0xf9f   : > { %v1772_v45 = vpop.xlane.xlu1 %1771 }
 0xfa0   : > { %2516 = vrcp.f32 %v1772_v45 }
 0xfaa   : > { %v2517_v46 = vpop.eup %2516 }
 0xfab   : > { %v1774_v47 = vmul.f32 %v2517_v46, %v2515_v43 }
 0xfad   : > { %v1775_v48 = vpack.c.bf16 %v1774_v47, %v1774_v47 }
 0xfaf   : > { %2347 = vmatmul.mubr.msk.bf16.vlgmr.msra.gmra.mrb[28].mxu0 %vm484_vm2, %v1775_v48 }
 0xfb0   : > { %2351 = vmatpush3.bf16.msra.mxu0 %v1831_v49  ;;  %2352 = vmatprep.mubr.msk.bf16.mxu0 %vm2782_vm0, %v2781_v0 }
0x1082   : > { %v1818_v8 = vpop.f32.mrb[28].mxu0 }
0x1083   : > { %v1824_v50 = vpack.c.bf16 %v1818_v8, %v1818_v8  ;;  %v2348_v51 = vpop.f32.mrb[29].mxu0 }
0x1084   : > { %v1821_v52 = vpop.f32.mrb[30].mxu0 }
0x1085   : > { %v2349_v53 = vpop.f32.mrb[31].mxu0  ;;  %2353 = vmatmul.mubr.msk.bf16.vlgmr.msra.gmra.mrb[24].mxu0 %vm484_vm2, %v1824_v50 }
0x1086   : > { %2675 = shalt.err (!%p2672_p10)
}
0x1087   : > { %s2676_s30 = scalar_lea.hbm %s3310_s20, 128  ;;  %s2680_s10 = scalar_lea.hbm %s3386_s5, 256 }
0x1088   : > { %p2677_p13 = scmp.ne.s32.totalorder %s3310_s20, %s2676_s30  ;;  %p2681_p9 = scmp.lt.u32.totalorder %s3310_s20, %s3386_s5 }
0x1089   : > { %p2682_p3 = scmp.lt.u32.totalorder %s2680_s10, %s2676_s30  ;;  %p2684_p12 = scmp.lt.u32.totalorder %s2676_s30, %s3310_s20 }
0x108a   : > { %p2678_p5 = pnand %p2677_p13, %p3412_p1 }
0x108b   : > { %p2683_p7 = por %p2682_p3, %p2681_p9 }
0x108c   : > { %p2679_p11 = pneg %p2678_p5 }
0x108d   : > { %p2685_p2 = por %p2684_p12, %p2683_p7 }
0x108f   : > { %p2686_p4 = pnand %p2685_p2, %p2679_p11 }
0x1091   : > { %2689 = shalt.err (!%p2686_p4)
}
0x1092   : > { %2396 = dma.vmem_to_hbm [thread:$0]  (%p3412_p1), %s1895_s26, 128, %s3310_s20, %s1876_s29  }
0x1093   : > { %s357_s13 = scalar_lea.vmem [#allocation12], %s3058_s4  ;;  %s3336_s27 = scalar_lea.hbm %s3387_s6, %s2116_s19 }
0x1094   : > { %s1907_s9 = sshll.u32 %s357_s13, 4  ;;  %s1881_s11 = scalar_lea.sflag [#allocation13], %s3055_s2  ;;  %s3338_s9 = int_to_ptr.vmem [resolvable:$true] %s1907_s9 }
0x1095   : > { %s2690_s26 = scalar_lea.vmem %s3338_s9, 128  ;;  %s2791_s25 = smov [#allocation12]  }
0x1096   : > { %p2691_p0 = scmp.ne.s32.totalorder %s3338_s9, %s2690_s26  ;;  %s2694_s4 = sshll.u32 %s2791_s25, 4  ;;  %s2695_s4 = int_to_ptr.vmem [resolvable:$false] %s2694_s4 }
0x1097   : > { %s2696_s19 = scalar_lea.vmem %s2695_s4, 256  ;;  %p2697_p10 = scmp.lt.s32.totalorder %s3338_s9, %s2695_s4 }
0x1098   : > { %p2692_p8 = pnand %p2691_p0, %p3412_p1  ;;  %p2698_p13 = scmp.lt.s32.totalorder %s2696_s19, %s2690_s26 }
0x109a   : > { %p2693_p6 = pneg %p2692_p8  ;;  %p2699_p5 = por %p2698_p13, %p2697_p10 }
0x109c   : > { %p2700_p11 = pnand %p2699_p5, %p2693_p6 }
0x1158   : > { %v1867_v0 = vpop.f32.mrb[24].mxu0 }
0x1159   : > { %1874 = vst.msk [vmem:[%s357_s13] sm:$0xff] %vm379_vm1, %v1867_v0  ;;  %v2354_v54 = vpop.f32.mrb[25].mxu0 }
0x115a   : > { %v1870_v5 = vpop.f32.mrb[26].mxu0 }
0x115b   : > { %2703 = shalt.err (!%p2700_p11)
}
0x115c   : > { %s2704_s2 = scalar_lea.hbm %s3336_s27, 128  ;;  %s2708_s30 = scalar_lea.hbm %s3387_s6, 256 }
0x115d   : > { %p2705_p9 = scmp.ne.s32.totalorder %s3336_s27, %s2704_s2  ;;  %p2709_p12 = scmp.lt.u32.totalorder %s3336_s27, %s3387_s6 }
0x115e   : > { %p2710_p2 = scmp.lt.u32.totalorder %s2708_s30, %s2704_s2  ;;  %p2712_p0 = scmp.lt.u32.totalorder %s2704_s2, %s3336_s27 }
0x115f   : > { %p2706_p3 = pnand %p2705_p9, %p3412_p1 }
0x1160   : > { %p2711_p4 = por %p2710_p2, %p2709_p12 }
0x1161   : > { %p2707_p7 = pneg %p2706_p3 }
0x1162   : > { %p2713_p8 = por %p2712_p0, %p2711_p4 }
0x1164   : > { %p2714_p6 = pnand %p2713_p8, %p2707_p7 }
0x1166   : > { %2717 = shalt.err (!%p2714_p6)
}
0x1167   : > { %2397 = dma.vmem_to_hbm [thread:$0]  (%p3412_p1), %s3338_s9, 128, %s3336_s27, %s1881_s11   ;;  %v2355_v56 = vpop.f32.mrb[27].mxu0 }
0x1168 PF: > { %s1919_s10 = sand.u32 1, %s2760_s21   ;;  %p3413_p10 = scmp.ne.s32.totalorder %s3396_s28, 0 }
0x1169   : > { %p3414_p13 = scmp.ge.s32.totalorder %s2772_s24, 2  ;;  %s1920_s3 = scalar_lea.sflag [#allocation4], %s1919_s10 }
0x116b   : > { %p2418_p5 = pnand %p3414_p13, %p3413_p10 }
0x116d   : > { %2751 = dma.done.wait (!%p2418_p5), %s1920_s3, 128  }
0x116e   : > { %2753 = vsyncadd (!%p2418_p5), %s1920_s3, 4294967168  ;;  %s1929_s12 = scalar_lea.sflag [#allocation13], %s1919_s10 }
0x116f   : > { %2755 = dma.done.wait (!%p2418_p5), %s1929_s12, 128  }
0x1170   : > { %2757 = vsyncadd (!%p2418_p5), %s1929_s12, 4294967168  ;;  %p27_p1 = scmp.ge.s32.totalorder %s2967_s18, 4   ;;  %s3415_s21 = smov %s2764_s22 }
0x1171   : > { %s3416_s22 = smov %s2768_s23  ;;  %s3417_s23 = smov %s2977_s14 }
0x1172   : > { %s3418_s24 = smov %s2967_s18  ;;  %29 = sbr.rel (!%p27_p1) target bundleno = 14 (0xe), region = 136 }
0x1179   :  { %1934 = vsyncpa [#allocation3], 1 }
0x117a   :  { %1936 = vsyncpa [#allocation3 + $0x1], 1 }
0x117b   :  { %1937 = vsyncpa [#allocation6], 1 }
0x117c   :  { %1939 = vsyncpa [#allocation6 + $0x1], 1 }
0x117d   :  { %1940 = vsyncpa [#allocation9], 1 }
0x117e   :  { %1941 = vsyncpa [#allocation4], 1 }
0x117f   :  { %1943 = vsyncpa [#allocation4 + $0x1], 1 }
0x1180   :  { %1944 = vsyncpa [#allocation13], 1 }
0x1181   :  { %1946 = vsyncpa [#allocation13 + $0x1], 1 }

</bundles_post_ra>
